<compile_context>
chip_gen: v6e
topology: v6e:2x2x1
jax: 0.10.0
libtpu: 0.0.40
codegen_flags: <defaults>
</compile_context>

<pallas_src>
import jax
import jax.numpy as jnp
from jax import lax
from jax.experimental import pallas as pl
from jax.experimental.pallas import tpu as pltpu


_EPS2 = 1e-24        # (1e-12)^2 -> matches torch F.normalize(eps=1e-12) under rsqrt
_LOGIT_MAX = 20.0    # relu(cos)*20 <= 20 -> constant exp-shift (denominator-free softmax)


def _round_up(x, m):
    return (x + m - 1) // m * m


def _pick_divisor(n, want):
    t = min(want, n)
    while n % t:
        t -= 1
    return t


# --------------------------------------------------------------------------
# 1) fused linear projection: y = x @ [W_cls | W_tok] + [b_cls | b_tok]
# --------------------------------------------------------------------------

def _fused_linear_kernel(x_ref, w_ref, b_ref, o_ref):
    o_ref[...] = (jnp.dot(x_ref[...], w_ref[...],
                          preferred_element_type=jnp.float32)
                  + b_ref[...]).astype(o_ref.dtype)


def fused_linear_pallas(x, w, b, *, tile_m=256):
    """Row-tiled linear with the (small) weight resident in VMEM."""
    M, Din = x.shape
    Dout = w.shape[1]
    Mp = _round_up(M, tile_m)
    if Mp != M:
        x = jnp.pad(x, ((0, Mp - M), (0, 0)))
    y = pl.pallas_call(
        _fused_linear_kernel,
        out_shape=jax.ShapeDtypeStruct((Mp, Dout), jnp.float32),
        grid=(Mp // tile_m,),
        in_specs=[
            pl.BlockSpec((tile_m, Din), lambda i: (i, 0)),   # streamed row tiles
            pl.BlockSpec((Din, Dout), lambda i: (0, 0)),     # resident weight
            pl.BlockSpec((1, Dout), lambda i: (0, 0)),       # resident bias
        ],
        out_specs=pl.BlockSpec((tile_m, Dout), lambda i: (i, 0)),
        compiler_params=pltpu.CompilerParams(
            dimension_semantics=("parallel",)),
    )(x, w, b.reshape(1, Dout))
    return y[:M]


# --------------------------------------------------------------------------
# 2) one-shot patch preparation (hoisted L2 norm + bf16 storage)
# --------------------------------------------------------------------------

def _patch_prep_kernel(pe_ref, pn_ref, pnorm_ref):
    pe = pe_ref[...]                                          # [Vb, P, E] f32
    ssq = jnp.sum(pe * pe, axis=-1, keepdims=True)            # [Vb, P, 1]
    pn_ref[...] = (pe * lax.rsqrt(jnp.maximum(ssq, _EPS2))).astype(pn_ref.dtype)
    pnorm_ref[...] = jnp.sqrt(ssq)                            # raw = pn * pnorm


def patch_prep_pallas(patch_embed, *, tile_b=8):
    B, P, E = patch_embed.shape
    Vb = _pick_divisor(B, tile_b)
    return pl.pallas_call(
        _patch_prep_kernel,
        out_shape=(jax.ShapeDtypeStruct((B, P, E), jnp.bfloat16),
                   jax.ShapeDtypeStruct((B, P, 1), jnp.float32)),
        grid=(B // Vb,),
        in_specs=[pl.BlockSpec((Vb, P, E), lambda i: (i, 0, 0))],
        out_specs=(pl.BlockSpec((Vb, P, E), lambda i: (i, 0, 0)),
                   pl.BlockSpec((Vb, P, 1), lambda i: (i, 0, 0))),
        compiler_params=pltpu.CompilerParams(
            dimension_semantics=("parallel",)),
    )(patch_embed)


# --------------------------------------------------------------------------
# 3) get_att_similarity (training hot path)
# --------------------------------------------------------------------------

def _att_sim_kernel(att_ref, pn_ref, pnorm_ref, mask_ref, sim_ref):
    Tt, A, E = att_ref.shape          # texts in this block, attrs, embed size
    Vt, P, _ = pn_ref.shape           # images in this block, patches
    C = Tt * A

    # F.normalize(p=2, dim=-1, eps=1e-12) on the attribute queries/keys
    att = att_ref[...]                                            # [Tt, A, E] f32 (values)
    qa = att * lax.rsqrt(jnp.maximum(
        jnp.sum(att * att, axis=-1, keepdims=True), _EPS2))
    qa2 = qa.reshape(C, E).astype(jnp.bfloat16)                   # [C, E]

    pn = pn_ref[...]                                              # [Vt, P, E] bf16 (unit rows)
    pn2 = pn.reshape(Vt * P, E)                                   # [VP, E]
    pnorm = pnorm_ref[...]                                        # [Vt, P, 1] f32 (raw = pn*pnorm)
    valid = 1.0 - mask_ref[...].reshape(1, C)                     # [1, C], 1 == valid attr

    # ---- shared logits + shared exp-weights -----------------------------------------
    # attn(p,(t,a)) = relu(<pn,qa>)*20 is used by BOTH attention directions (it is its
    # own transpose).  Softmax denominators cancel under the later L2 normalisation, so
    # a constant shift replaces the per-row max and ONE exp serves both branches.  The
    # column mask is simultaneously the key-mask of attend_att and the attended-row
    # zeroing of attend_patch (exact vs the reference's -1e9 fill / row zeroing).
    logits = lax.dot_general(pn2, qa2, (((1,), (1,)), ((), ())),
                             preferred_element_type=jnp.float32)  # [VP, C]
    ew = jnp.exp(jnp.maximum(logits, 0.0) * 20.0 - _LOGIT_MAX) * valid

    # ---- attend_patch: q = attributes, k = v = patches, softmax over P ---------------
    # Patch norms are folded into the weights so the value matmul sees the raw patches
    # without re-materialising them; swapaxes keeps the MXU contraction canonical.
    ew3 = ew.reshape(Vt, P, C)
    wp = jnp.swapaxes(ew3 * pnorm, 1, 2).astype(jnp.bfloat16)     # [Vt, C, P]
    ap = jnp.einsum('vcp,vpe->vce', wp, pn,
                    preferred_element_type=jnp.float32)           # [Vt, C, E]
    ap_n = ap * lax.rsqrt(jnp.maximum(
        jnp.sum(ap * ap, axis=-1, keepdims=True), _EPS2))

    # ---- attend_att (per text) + exact factorised contraction ------------------------
    #   sum_{p,a} <aa_n[p], ap_n[a]>  ==  <sum_p aa_n[p], sum_a ap_n[a]>
    rows = []
    for t in range(Tt):                 # static unroll, Tt is small (<= 8)
        ea = ew[:, t * A:(t + 1) * A]                                   # [VP, A]
        aa = jnp.dot(ea, att[t], preferred_element_type=jnp.float32)    # [VP, E]
        aa_n = aa * lax.rsqrt(jnp.maximum(
            jnp.sum(aa * aa, axis=-1, keepdims=True), _EPS2))
        red_att = jnp.sum(aa_n.reshape(Vt, P, E), axis=1)               # sum_p -> [Vt, E]
        red_patch = jnp.sum(ap_n[:, t * A:(t + 1) * A, :], axis=1)      # sum_a -> [Vt, E]
        rows.append(jnp.sum(red_att * red_patch, axis=-1)[None, :])     # [1, Vt]
    sim_ref[0] = jnp.concatenate(rows, axis=0)                          # [Tt, Vt]


def att_similarity_pallas(att_embed, pn, pnorm, att_mask, *, tile_t=8, tile_v=8):
    """Un-scaled similarity sum_{p,a} <attend_att_n, attend_patch_n> -> [Bt, Bv]."""
    B, A, E = att_embed.shape
    _, P, _ = pn.shape
    Tt = _pick_divisor(B, tile_t)
    if Tt % 8 != 0 and Tt != B:          # sublane constraint of the output block
        Tt = B
    # NOTE: at production scale raise tile_v (lane-dense output writes) subject to the
    # VMEM budget (logits are [Vt*P, Tt*A] f32); re-derive for v7x's 64 MiB per core.
    Vt = _pick_divisor(B, tile_v)
    nt, nv = B // Tt, B // Vt
    mask_in = att_mask.astype(jnp.float32).reshape(nt, 1, Tt * A)

    sim3 = pl.pallas_call(
        _att_sim_kernel,
        out_shape=jax.ShapeDtypeStruct((nv, B, Vt), jnp.float32),
        grid=(nt, nv),                           # texts outer; image tiles streamed inner
        in_specs=[
            pl.BlockSpec((Tt, A, E), lambda ti, vi: (ti, 0, 0)),      # raw attr embeds (f32)
            pl.BlockSpec((Vt, P, E), lambda ti, vi: (vi, 0, 0)),      # unit patches (bf16)
            pl.BlockSpec((Vt, P, 1), lambda ti, vi: (vi, 0, 0)),      # patch norms (f32)
            pl.BlockSpec((1, 1, Tt * A), lambda ti, vi: (ti, 0, 0)),  # padding mask
        ],
        out_specs=pl.BlockSpec((1, Tt, Vt), lambda ti, vi: (vi, ti, 0)),
        compiler_params=pltpu.CompilerParams(
            dimension_semantics=("parallel", "parallel"),
            vmem_limit_bytes=32 * 1024 * 1024),
    )(att_embed, pn, pnorm, mask_in)
    return jnp.transpose(sim3, (1, 0, 2)).reshape(B, B)


# --------------------------------------------------------------------------
# parameters & forward
# --------------------------------------------------------------------------

def init_params(key, visual_size, textual_size, embed_size):
    ks = jax.random.split(key, 4)

    def lin(k, din, dout):
        # nn.Linear weight [out, in], kaiming_normal_(mode='fan_out') -> std = sqrt(2/out)
        w = jax.random.normal(k, (dout, din), jnp.float32) * jnp.sqrt(2.0 / dout)
        return w.T, jnp.zeros((dout,), jnp.float32)

    Wv, bv = lin(ks[0], visual_size, embed_size)
    Wt, bt = lin(ks[1], textual_size, embed_size)
    Wp, bp = lin(ks[2], visual_size, embed_size)
    Wa, ba = lin(ks[3], textual_size, embed_size)
    return dict(Wv=Wv, bv=bv, Wt=Wt, bt=bt, Wp=Wp, bp=bp, Wa=Wa, ba=ba)


def _project(params, visual_feature, textual_feature):
    B, T_v, Dv = visual_feature.shape
    _, T_t, Dt = textual_feature.shape
    E = params['Wv'].shape[1]

    # Fuse the CLS / token projections per modality: one launch, one HBM read.
    w_vis = jnp.concatenate([params['Wv'], params['Wp']], axis=1)    # [Dv, 2E]
    b_vis = jnp.concatenate([params['bv'], params['bp']], axis=0)
    y_vis = fused_linear_pallas(visual_feature.reshape(B * T_v, Dv),
                                w_vis, b_vis).reshape(B, T_v, 2 * E)
    visual_embed = y_vis[:, 0, :E]
    patch_embed = y_vis[:, 1:, E:]

    w_txt = jnp.concatenate([params['Wt'], params['Wa']], axis=1)    # [Dt, 2E]
    b_txt = jnp.concatenate([params['bt'], params['ba']], axis=0)
    y_txt = fused_linear_pallas(textual_feature.reshape(B * T_t, Dt),
                                w_txt, b_txt).reshape(B, T_t, 2 * E)
    textual_embed = y_txt[:, 0, :E]
    att_embed = y_txt[:, 1:, E:]
    return visual_embed, patch_embed, textual_embed, att_embed


def direct_hb_head_forward(params, visual_feature, textual_feature, mask,
                           att_nums, captions=None, training=False):
    # The AdaptiveAvgPool2d branch only applies to CNN backbones (avgpool=None for ViT).
    visual_embed, patch_embed, textual_embed, att_embed = _project(
        params, visual_feature, textual_feature)
    A = att_embed.shape[1]

    if training:
        pn, pnorm = patch_prep_pallas(patch_embed)      # hoisted L2 norm + bf16 storage
        sim_raw = att_similarity_pallas(att_embed, pn, pnorm, mask[:, 1:])
        # reference: (similarity / att_nums).sum(dim=P).mean(dim=A)  (A = full attr count)
        local_similarity = sim_raw / (att_nums[:, None] * A)
        patch_mean = jnp.mean(patch_embed, axis=1)
        att_sum = jnp.sum(att_embed / att_nums.reshape(-1, 1, 1), axis=1)
        # TODO(synk): make_loss_evaluator / loss_evaluator is an external, config-dependent
        # loss module; return the tensors that would feed it instead of faking losses.
        return None, dict(visual_embed=visual_embed, textual_embed=textual_embed,
                          patch_embed=patch_mean, att_embed=att_sum,
                          local_similarity=local_similarity)

    return [visual_embed, textual_embed, att_nums], None


# --------------------------------------------------------------------------
# pure-jnp reference (faithful transcription of the PyTorch spec) + demo
# --------------------------------------------------------------------------

def _l2n(x, eps=1e-12):
    return x / jnp.maximum(jnp.sqrt(jnp.sum(x * x, axis=-1, keepdims=True)), eps)


def _ref_att_similarity(att_embed, patch_raw, att_mask, att_nums):
    hp = jax.lax.Precision.HIGHEST
    qa = _l2n(att_embed)                                   # [Bt, A, E]
    pk = _l2n(patch_raw)                                   # [Bv, P, E]
    # attend_patch_embed[v, t, a]: q = att[t], k = v = patch[v]
    attn_p = jnp.einsum('tae,vpe->vtap', qa, pk, precision=hp)
    attn_p = jax.nn.softmax(jnp.maximum(attn_p, 0.0) * 20.0, axis=-1)
    ap = jnp.einsum('vtap,vpe->vtae', attn_p, patch_raw, precision=hp)
    ap = jnp.where(att_mask[None, :, :, None] > 0.5, 0.0, ap)
    ap = _l2n(ap)
    # attend_att_embed[t, v, p]: q = patch[v], k = v = att[t], key mask = att_mask
    attn_a = jnp.einsum('vpe,tae->tvpa', pk, qa, precision=hp)
    attn_a = jnp.maximum(attn_a, 0.0) * 20.0
    attn_a = jnp.where(att_mask[:, None, None, :] > 0.5, -1e9, attn_a)
    attn_a = jax.nn.softmax(attn_a, axis=-1)
    aa = _l2n(jnp.einsum('tvpa,tae->tvpe', attn_a, att_embed, precision=hp))
    sim = jnp.einsum('tvpe,vtae->tvpa', aa, ap, precision=hp)
    sim = sim / att_nums[:, None, None, None]
    return sim.sum(axis=2).mean(axis=2)                    # [Bt, Bv]


def _assert_close(name, got, want, rtol, atol):
    got = jnp.asarray(got, jnp.float32)
    want = jnp.asarray(want, jnp.float32)
    ok = bool(jnp.all(jnp.abs(got - want) <= atol + rtol * jnp.abs(want)))
    if not ok:
        raise AssertionError(
            f"{name}: max |diff| = {float(jnp.max(jnp.abs(got - want))):.4e}")


if __name__ == "__main__":
    B, P, A = 16, 16, 8
    Dv, Dt, E = 192, 160, 128

    key = jax.random.PRNGKey(0)
    kp, kv, kt = jax.random.split(key, 3)
    params = init_params(kp, Dv, Dt, E)

    visual_feature = jax.random.normal(kv, (B, 1 + P, Dv), jnp.float32)
    textual_feature = jax.random.normal(kt, (B, 1 + A, Dt), jnp.float32)
    n_valid = 4 + (jnp.arange(B) % 5)                         # 4..8 valid attributes
    att_mask = (jnp.arange(A)[None, :] >= n_valid[:, None]).astype(jnp.float32)
    mask = jnp.concatenate([jnp.zeros((B, 1), jnp.float32), att_mask], axis=1)
    att_nums = n_valid.astype(jnp.float32)

    fwd = jax.jit(direct_hb_head_forward, static_argnames=("training",))
    outputs, _ = fwd(params, visual_feature, textual_feature, mask, att_nums,
                     training=False)
    _, aux = fwd(params, visual_feature, textual_feature, mask, att_nums,
                 training=True)
    jax.block_until_ready((outputs, aux))

    # ---- lightweight structural checks against a pure-jnp transcription of the spec ----
    hp = jax.lax.Precision.HIGHEST
    _assert_close("visual_embed", outputs[0],
                  jnp.dot(visual_feature[:, 0], params['Wv'], precision=hp) + params['bv'],
                  rtol=3e-2, atol=3e-2)
    _assert_close("textual_embed", outputs[1],
                  jnp.dot(textual_feature[:, 0], params['Wt'], precision=hp) + params['bt'],
                  rtol=3e-2, atol=3e-2)

    _, patch_embed, _, att_embed = _project(params, visual_feature, textual_feature)
    pn, pnorm = patch_prep_pallas(patch_embed)
    sim_raw = att_similarity_pallas(att_embed, pn, pnorm, att_mask)
    local_sim = sim_raw / (att_nums[:, None] * A)
    patch_eff = pn.astype(jnp.float32) * pnorm            # raw patches as the kernel sees them
    ref_sim = _ref_att_similarity(att_embed, patch_eff, att_mask, att_nums)
    _assert_close("local_similarity", local_sim, ref_sim, rtol=8e-2, atol=5e-2)
    _assert_close("aux.local_similarity", aux["local_similarity"], local_sim,
                  rtol=1e-3, atol=1e-3)

    print("KERNEL_OK")
</pallas_src>

<mosaic_0001>
module attributes {stable_mosaic.version = 11 : i64} {
  func.func @_fused_linear_kernel(%arg0: i32, %arg1: memref<256x192xf32, #tpu.memory_space<vmem>>, %arg2: memref<192x256xf32, #tpu.memory_space<vmem>>, %arg3: memref<1x256xf32, #tpu.memory_space<vmem>>, %arg4: memref<256x256xf32, #tpu.memory_space<vmem>>) attributes {dimension_semantics = [#tpu.dimension_semantics<parallel>], iteration_bounds = array<i64: 2>, scalar_prefetch = 0 : i64, scratch_operands = 0 : i64, tpu.core_type = #tpu.core_type<tc>, window_params = [{transform_indices = @transform_0, window_bounds = array<i64: 256, 192>}, {pipeline_mode = #tpu.pipeline_mode<synchronous>, transform_indices = @transform_1, window_bounds = array<i64: 192, 256>}, {pipeline_mode = #tpu.pipeline_mode<synchronous>, transform_indices = @transform_2, window_bounds = array<i64: 1, 256>}, {transform_indices = @transform_3, window_bounds = array<i64: 256, 256>}]} {
    %c0 = arith.constant 0 : index
    %c0_0 = arith.constant 0 : index
    %0 = vector.load %arg1[%c0, %c0_0] : memref<256x192xf32, #tpu.memory_space<vmem>>, vector<256x192xf32>
    %c0_1 = arith.constant 0 : index
    %c0_2 = arith.constant 0 : index
    %1 = vector.load %arg2[%c0_1, %c0_2] : memref<192x256xf32, #tpu.memory_space<vmem>>, vector<192x256xf32>
    %cst = arith.constant dense<0.000000e+00> : vector<256x256xf32>
    %2 = tpu.matmul %0, %1, %cst {dimension_numbers = #tpu.dot_dimension_numbers<[1], [0], [0], [1], [0, 0, 1, 1], [], []>} : vector<256x192xf32>, vector<192x256xf32>, vector<256x256xf32> -> vector<256x256xf32>
    %c0_3 = arith.constant 0 : index
    %c0_4 = arith.constant 0 : index
    %3 = vector.load %arg3[%c0_3, %c0_4] : memref<1x256xf32, #tpu.memory_space<vmem>>, vector<1x256xf32>
    %4 = vector.broadcast %3 : vector<1x256xf32> to vector<256x256xf32>
    %5 = arith.addf %2, %4 : vector<256x256xf32>
    %c0_5 = arith.constant 0 : index
    %c0_6 = arith.constant 0 : index
    %6 = vector.load %arg4[%c0_5, %c0_6] : memref<256x256xf32, #tpu.memory_space<vmem>>, vector<256x256xf32>
    tpu.vector_store %arg4[%c0_5, %c0_6], %5 {strides = array<i32>} : memref<256x256xf32, #tpu.memory_space<vmem>>, vector<256x256xf32>,
    return
  }
  func.func @transform_0(%arg0: i32) -> (i32, i32) {
    %c0_i32 = arith.constant 0 : i32
    %c0_i32_0 = arith.constant 0 : i32
    return %arg0, %c0_i32 : i32, i32
  }
  func.func @transform_1(%arg0: i32) -> (i32, i32) {
    %c0_i32 = arith.constant 0 : i32
    %c0_i32_0 = arith.constant 0 : i32
    %c0_i32_1 = arith.constant 0 : i32
    return %c0_i32, %c0_i32_0 : i32, i32
  }
  func.func @transform_2(%arg0: i32) -> (i32, i32) {
    %c0_i32 = arith.constant 0 : i32
    %c0_i32_0 = arith.constant 0 : i32
    %c0_i32_1 = arith.constant 0 : i32
    return %c0_i32, %c0_i32_0 : i32, i32
  }
  func.func @transform_3(%arg0: i32) -> (i32, i32) {
    %c0_i32 = arith.constant 0 : i32
    %c0_i32_0 = arith.constant 0 : i32
    return %arg0, %c0_i32 : i32, i32
  }
}

module attributes {stable_mosaic.version = 11 : i64} {
  func.func @_fused_linear_kernel(%arg0: i32, %arg1: memref<256x160xf32, #tpu.memory_space<vmem>>, %arg2: memref<160x256xf32, #tpu.memory_space<vmem>>, %arg3: memref<1x256xf32, #tpu.memory_space<vmem>>, %arg4: memref<256x256xf32, #tpu.memory_space<vmem>>) attributes {dimension_semantics = [#tpu.dimension_semantics<parallel>], iteration_bounds = array<i64: 1>, scalar_prefetch = 0 : i64, scratch_operands = 0 : i64, tpu.core_type = #tpu.core_type<tc>, window_params = [{transform_indices = @transform_0, window_bounds = array<i64: 256, 160>}, {pipeline_mode = #tpu.pipeline_mode<synchronous>, transform_indices = @transform_1, window_bounds = array<i64: 160, 256>}, {pipeline_mode = #tpu.pipeline_mode<synchronous>, transform_indices = @transform_2, window_bounds = array<i64: 1, 256>}, {transform_indices = @transform_3, window_bounds = array<i64: 256, 256>}]} {
    %c0 = arith.constant 0 : index
    %c0_0 = arith.constant 0 : index
    %0 = vector.load %arg1[%c0, %c0_0] : memref<256x160xf32, #tpu.memory_space<vmem>>, vector<256x160xf32>
    %c0_1 = arith.constant 0 : index
    %c0_2 = arith.constant 0 : index
    %1 = vector.load %arg2[%c0_1, %c0_2] : memref<160x256xf32, #tpu.memory_space<vmem>>, vector<160x256xf32>
    %cst = arith.constant dense<0.000000e+00> : vector<256x256xf32>
    %2 = tpu.matmul %0, %1, %cst {dimension_numbers = #tpu.dot_dimension_numbers<[1], [0], [0], [1], [0, 0, 1, 1], [], []>} : vector<256x160xf32>, vector<160x256xf32>, vector<256x256xf32> -> vector<256x256xf32>
    %c0_3 = arith.constant 0 : index
    %c0_4 = arith.constant 0 : index
    %3 = vector.load %arg3[%c0_3, %c0_4] : memref<1x256xf32, #tpu.memory_space<vmem>>, vector<1x256xf32>
    %4 = vector.broadcast %3 : vector<1x256xf32> to vector<256x256xf32>
    %5 = arith.addf %2, %4 : vector<256x256xf32>
    %c0_5 = arith.constant 0 : index
    %c0_6 = arith.constant 0 : index
    %6 = vector.load %arg4[%c0_5, %c0_6] : memref<256x256xf32, #tpu.memory_space<vmem>>, vector<256x256xf32>
    tpu.vector_store %arg4[%c0_5, %c0_6], %5 {strides = array<i32>} : memref<256x256xf32, #tpu.memory_space<vmem>>, vector<256x256xf32>,
    return
  }
  func.func @transform_0(%arg0: i32) -> (i32, i32) {
    %c0_i32 = arith.constant 0 : i32
    %c0_i32_0 = arith.constant 0 : i32
    return %arg0, %c0_i32 : i32, i32
  }
  func.func @transform_1(%arg0: i32) -> (i32, i32) {
    %c0_i32 = arith.constant 0 : i32
    %c0_i32_0 = arith.constant 0 : i32
    %c0_i32_1 = arith.constant 0 : i32
    return %c0_i32, %c0_i32_0 : i32, i32
  }
  func.func @transform_2(%arg0: i32) -> (i32, i32) {
    %c0_i32 = arith.constant 0 : i32
    %c0_i32_0 = arith.constant 0 : i32
    %c0_i32_1 = arith.constant 0 : i32
    return %c0_i32, %c0_i32_0 : i32, i32
  }
  func.func @transform_3(%arg0: i32) -> (i32, i32) {
    %c0_i32 = arith.constant 0 : i32
    %c0_i32_0 = arith.constant 0 : i32
    return %arg0, %c0_i32 : i32, i32
  }
}

</mosaic_0001>

<bundles_post_ra>
// kernel: direct_hb_head_forward.2
= control target key start
LH: loop header
LB: loop body
LE: loop exit
PB: predicated region body
PF: predicated region fallthrough
CT: control target
= control target key end

     0   :  { %s910_s12 = smov 0   ;;  %s1315_s0 = inlined_call_operand.vmem [shape: f32[512,192], index: 0, kind: input, shape index: {}]   ;;  %s1316_s1 = inlined_call_operand.vmem [shape: f32[192,256], index: 1, kind: input, shape index: {}]   ;;  %s1317_s2 = inlined_call_operand.vmem [shape: f32[1,256], index: 2, kind: input, shape index: {}]   ;;  %s1318_s3 = inlined_call_operand.vmem [shape: f32[512,256], index: 3, kind: output, shape index: {}]  }
   0x1 LB: > { %s779_s13 = sadd.s32 4294967295, %s888_s12   ;;  %p783_p0 = scmp.ge.s32.totalorder %s888_s12, 1  ;;  %s888_s12 = sphi %s910_s12, %s13_s12  }
   0x2   : > { %p139_p1 = scmp.lt.s32.totalorder %s888_s12, 3 }
   0x4   : > { %p140_p2 = pnand %p783_p0, %p139_p1 }
   0x5   : > { %s784_s28 = sshll.u32 (!%p140_p2), %s779_s13, 5 }
   0x6   : > { %143 = sbr.rel (%p140_p2) target bundleno = 319 (0x13f), region = 32  ;;  %p166_p3 = scmp.lt.s32.totalorder (!%p140_p2), %s784_s28, 63 }
   0xb   : > { %v274_v0 = vld [vmem:[%s1316_s1 + $0xf8] sm:$0xff]  ;;  %v273_v1 = vld [vmem:[%s1316_s1 + $0xf0] sm:$0xff]  ;;  %v272_v2 = vld [vmem:[%s1316_s1 + $0xe8] sm:$0xff]  ;;  %s1320_s28 = smov (!%p166_p3, %s784_s28), 63  ;;  %vm303_vm0 = vcmask 523264  }
   0xc   : > { %400 = vmatprep.subr.mxu0 %v274_v0  ;;  %826 = vmatprep.subr.mxu1 %v274_v0  ;;  %v271_v3 = vld [vmem:[%s1316_s1 + $0xe0] sm:$0xff]  ;;  %v270_v4 = vld [vmem:[%s1316_s1 + $0xd8] sm:$0xff]  ;;  %v269_v5 = vld [vmem:[%s1316_s1 + $0xd0] sm:$0xff]  ;;  %s824_s25 = sshll.u32 %s1320_s28, 4 }
   0xd   : > { %401 = vmatpush1.msra.mxu0 %v273_v1  ;;  %850 = vmatpush1.msra.mxu1 %v273_v1  ;;  %v268_v6 = vld [vmem:[%s1316_s1 + $0xc8] sm:$0xff]  ;;  %v267_v7 = vld [vmem:[%s1316_s1 + $0xc0] sm:$0xff]  ;;  %v266_v8 = vld [vmem:[%s1316_s1 + $0xb8] sm:$0xff]  ;;  %s1066_s13 = scalar_lea.vmem %s1315_s0, %s824_s25  ;;  %s1182_s18 = scalar_lea.vmem %s1318_s3, %s824_s25 }
   0xe   : > { %402 = vmatprep.subr.mxu0 %v272_v2  ;;  %827 = vmatprep.subr.mxu1 %v272_v2  ;;  %v265_v9 = vld [vmem:[%s1316_s1 + $0xb0] sm:$0xff]  ;;  %v264_v10 = vld [vmem:[%s1316_s1 + $0xa8] sm:$0xff]  ;;  %v263_v11 = vld [vmem:[%s1316_s1 + $0xa0] sm:$0xff] }
   0xf   : > { %403 = vmatpush1.msra.mxu0 %v271_v3  ;;  %851 = vmatpush1.msra.mxu1 %v271_v3  ;;  %v262_v12 = vld [vmem:[%s1316_s1 + $0x98] sm:$0xff]  ;;  %v261_v13 = vld [vmem:[%s1316_s1 + $0x90] sm:$0xff]  ;;  %v260_v14 = vld [vmem:[%s1316_s1 + $0x88] sm:$0xff] }
  0x10   : > { %404 = vmatprep.subr.mxu0 %v270_v4  ;;  %828 = vmatprep.subr.mxu1 %v270_v4  ;;  %v259_v15 = vld [vmem:[%s1316_s1 + $0x80] sm:$0xff]  ;;  %v258_v16 = vld [vmem:[%s1316_s1 + $0x78] sm:$0xff]  ;;  %v257_v17 = vld [vmem:[%s1316_s1 + $0x70] sm:$0xff] }
  0x11   : > { %405 = vmatpush1.msra.mxu0 %v269_v5  ;;  %852 = vmatpush1.msra.mxu1 %v269_v5  ;;  %v256_v18 = vld [vmem:[%s1316_s1 + $0x68] sm:$0xff]  ;;  %v255_v19 = vld [vmem:[%s1316_s1 + $0x60] sm:$0xff]  ;;  %v254_v20 = vld [vmem:[%s1316_s1 + $0x58] sm:$0xff] }
  0x12   : > { %406 = vmatprep.subr.mxu0 %v268_v6  ;;  %829 = vmatprep.subr.mxu1 %v268_v6  ;;  %v253_v21 = vld [vmem:[%s1316_s1 + $0x50] sm:$0xff]  ;;  %v252_v22 = vld [vmem:[%s1316_s1 + $0x48] sm:$0xff]  ;;  %v251_v23 = vld [vmem:[%s1316_s1 + $0x40] sm:$0xff] }
  0x13   : > { %407 = vmatpush1.msra.mxu0 %v267_v7  ;;  %853 = vmatpush1.msra.mxu1 %v267_v7  ;;  %v250_v24 = vld [vmem:[%s1316_s1 + $0x38] sm:$0xff]  ;;  %v249_v25 = vld [vmem:[%s1316_s1 + $0x30] sm:$0xff]  ;;  %v248_v26 = vld [vmem:[%s1316_s1 + $0x28] sm:$0xff] }
  0x14   : > { %408 = vmatprep.subr.mxu0 %v266_v8  ;;  %830 = vmatprep.subr.mxu1 %v266_v8  ;;  %v247_v27 = vld [vmem:[%s1316_s1 + $0x20] sm:$0xff]  ;;  %v246_v28 = vld [vmem:[%s1316_s1 + $0x18] sm:$0xff]  ;;  %v245_v29 = vld [vmem:[%s1316_s1 + $0x10] sm:$0xff] }
  0x15   : > { %409 = vmatpush1.msra.mxu0 %v265_v9  ;;  %854 = vmatpush1.msra.mxu1 %v265_v9  ;;  %v244_v30 = vld [vmem:[%s1316_s1 + $0x8] sm:$0xff]  ;;  %v243_v31 = vld [vmem:[%s1316_s1] sm:$0xff]  ;;  %v290_v32 = vld [vmem:[%s1316_s1 + $0x178] sm:$0xff] }
  0x16   : > { %410 = vmatprep.subr.mxu0 %v264_v10  ;;  %831 = vmatprep.subr.mxu1 %v264_v10  ;;  %v289_v33 = vld [vmem:[%s1316_s1 + $0x170] sm:$0xff]  ;;  %v288_v34 = vld [vmem:[%s1316_s1 + $0x168] sm:$0xff]  ;;  %v287_v35 = vld [vmem:[%s1316_s1 + $0x160] sm:$0xff] }
  0x17   : > { %411 = vmatpush1.msra.mxu0 %v263_v11  ;;  %855 = vmatpush1.msra.mxu1 %v263_v11  ;;  %v286_v36 = vld [vmem:[%s1316_s1 + $0x158] sm:$0xff]  ;;  %v285_v37 = vld [vmem:[%s1316_s1 + $0x150] sm:$0xff]  ;;  %v284_v38 = vld [vmem:[%s1316_s1 + $0x148] sm:$0xff] }
  0x18   : > { %412 = vmatprep.subr.mxu0 %v262_v12  ;;  %832 = vmatprep.subr.mxu1 %v262_v12  ;;  %v283_v39 = vld [vmem:[%s1316_s1 + $0x140] sm:$0xff]  ;;  %v282_v40 = vld [vmem:[%s1316_s1 + $0x138] sm:$0xff]  ;;  %v281_v41 = vld [vmem:[%s1316_s1 + $0x130] sm:$0xff] }
  0x19   : > { %413 = vmatpush1.msra.mxu0 %v261_v13  ;;  %856 = vmatpush1.msra.mxu1 %v261_v13  ;;  %v280_v42 = vld [vmem:[%s1316_s1 + $0x128] sm:$0xff]  ;;  %v279_v43 = vld [vmem:[%s1316_s1 + $0x120] sm:$0xff]  ;;  %v278_v44 = vld [vmem:[%s1316_s1 + $0x118] sm:$0xff] }
  0x1a   : > { %414 = vmatprep.subr.mxu0 %v260_v14  ;;  %833 = vmatprep.subr.mxu1 %v260_v14  ;;  %v277_v45 = vld [vmem:[%s1316_s1 + $0x110] sm:$0xff]  ;;  %v276_v46 = vld [vmem:[%s1316_s1 + $0x108] sm:$0xff]  ;;  %v275_v47 = vld [vmem:[%s1316_s1 + $0x100] sm:$0xff] }
  0x1b   : > { %415 = vmatpush1.msra.mxu0 %v259_v15  ;;  %857 = vmatpush1.msra.mxu1 %v259_v15  ;;  %v180_v48 = vld [vmem:[%s1066_s13 + $0x8] sm:$0xff]  ;;  %v179_v50 = vld [vmem:[%s1066_s13] sm:$0xff]  ;;  %v182_v52 = vld [vmem:[%s1066_s13 + $0x18] sm:$0xff] }
  0x1c   : > { %416 = vmatprep.subr.mxu0 %v258_v16  ;;  %834 = vmatprep.subr.mxu1 %v258_v16  ;;  %v212_v49 = vld [vmem:[%s1066_s13 + $0x108] sm:$0xff]  ;;  %v211_v51 = vld [vmem:[%s1066_s13 + $0x100] sm:$0xff]  ;;  %v214_v53 = vld [vmem:[%s1066_s13 + $0x118] sm:$0xff] }
  0x1d   : > { %417 = vmatpush1.msra.mxu0 %v257_v17  ;;  %858 = vmatpush1.msra.mxu1 %v257_v17  ;;  %v181_v54 = vld [vmem:[%s1066_s13 + $0x10] sm:$0xff]  ;;  %v184_v56 = vld [vmem:[%s1066_s13 + $0x28] sm:$0xff]  ;;  %v183_v58 = vld [vmem:[%s1066_s13 + $0x20] sm:$0xff] }
  0x1e   : > { %418 = vmatprep.subr.mxu0 %v256_v18  ;;  %835 = vmatprep.subr.mxu1 %v256_v18  ;;  %v213_v55 = vld [vmem:[%s1066_s13 + $0x110] sm:$0xff]  ;;  %v216_v57 = vld [vmem:[%s1066_s13 + $0x128] sm:$0xff]  ;;  %v215_v59 = vld [vmem:[%s1066_s13 + $0x120] sm:$0xff] }
  0x1f   : > { %419 = vmatpush1.msra.mxu0 %v255_v19  ;;  %859 = vmatpush1.msra.mxu1 %v255_v19  ;;  %v186_v60 = vld [vmem:[%s1066_s13 + $0x38] sm:$0xff]  ;;  %v185_v62 = vld [vmem:[%s1066_s13 + $0x30] sm:$0xff]  ;;  %v188_v0 = vld [vmem:[%s1066_s13 + $0x48] sm:$0xff] }
  0x20   : > { %420 = vmatprep.subr.mxu0 %v254_v20  ;;  %836 = vmatprep.subr.mxu1 %v254_v20  ;;  %v218_v61 = vld [vmem:[%s1066_s13 + $0x138] sm:$0xff]  ;;  %v217_v63 = vld [vmem:[%s1066_s13 + $0x130] sm:$0xff]  ;;  %v220_v1 = vld [vmem:[%s1066_s13 + $0x148] sm:$0xff] }
  0x21   : > { %421 = vmatpush1.msra.mxu0 %v253_v21  ;;  %860 = vmatpush1.msra.mxu1 %v253_v21  ;;  %v187_v2 = vld [vmem:[%s1066_s13 + $0x40] sm:$0xff]  ;;  %v190_v4 = vld [vmem:[%s1066_s13 + $0x58] sm:$0xff]  ;;  %v189_v6 = vld [vmem:[%s1066_s13 + $0x50] sm:$0xff] }
  0x22   : > { %422 = vmatprep.subr.mxu0 %v252_v22  ;;  %837 = vmatprep.subr.mxu1 %v252_v22  ;;  %v219_v3 = vld [vmem:[%s1066_s13 + $0x140] sm:$0xff]  ;;  %v222_v5 = vld [vmem:[%s1066_s13 + $0x158] sm:$0xff]  ;;  %v221_v7 = vld [vmem:[%s1066_s13 + $0x150] sm:$0xff] }
  0x23   : > { %423 = vmatpush1.msra.mxu0 %v251_v23  ;;  %861 = vmatpush1.msra.mxu1 %v251_v23  ;;  %v192_v8 = vld [vmem:[%s1066_s13 + $0x68] sm:$0xff]  ;;  %v191_v10 = vld [vmem:[%s1066_s13 + $0x60] sm:$0xff]  ;;  %v194_v12 = vld [vmem:[%s1066_s13 + $0x78] sm:$0xff] }
  0x24   : > { %424 = vmatprep.subr.mxu0 %v250_v24  ;;  %838 = vmatprep.subr.mxu1 %v250_v24  ;;  %v224_v9 = vld [vmem:[%s1066_s13 + $0x168] sm:$0xff]  ;;  %v223_v11 = vld [vmem:[%s1066_s13 + $0x160] sm:$0xff]  ;;  %v226_v13 = vld [vmem:[%s1066_s13 + $0x178] sm:$0xff] }
  0x25   : > { %425 = vmatpush1.msra.mxu0 %v249_v25  ;;  %862 = vmatpush1.msra.mxu1 %v249_v25  ;;  %v193_v14 = vld [vmem:[%s1066_s13 + $0x70] sm:$0xff]  ;;  %v196_v16 = vld [vmem:[%s1066_s13 + $0x88] sm:$0xff]  ;;  %v195_v18 = vld [vmem:[%s1066_s13 + $0x80] sm:$0xff] }
  0x26   : > { %426 = vmatprep.subr.mxu0 %v248_v26  ;;  %839 = vmatprep.subr.mxu1 %v248_v26  ;;  %v225_v15 = vld [vmem:[%s1066_s13 + $0x170] sm:$0xff]  ;;  %v228_v17 = vld [vmem:[%s1066_s13 + $0x188] sm:$0xff]  ;;  %v227_v19 = vld [vmem:[%s1066_s13 + $0x180] sm:$0xff] }
  0x27   : > { %427 = vmatpush1.msra.mxu0 %v247_v27  ;;  %863 = vmatpush1.msra.mxu1 %v247_v27  ;;  %v198_v20 = vld [vmem:[%s1066_s13 + $0x98] sm:$0xff]  ;;  %v197_v22 = vld [vmem:[%s1066_s13 + $0x90] sm:$0xff]  ;;  %v200_v24 = vld [vmem:[%s1066_s13 + $0xa8] sm:$0xff] }
  0x28   : > { %428 = vmatprep.subr.mxu0 %v246_v28  ;;  %840 = vmatprep.subr.mxu1 %v246_v28  ;;  %v230_v21 = vld [vmem:[%s1066_s13 + $0x198] sm:$0xff]  ;;  %v229_v23 = vld [vmem:[%s1066_s13 + $0x190] sm:$0xff]  ;;  %v232_v25 = vld [vmem:[%s1066_s13 + $0x1a8] sm:$0xff] }
  0x29   : > { %429 = vmatpush1.msra.mxu0 %v245_v29  ;;  %864 = vmatpush1.msra.mxu1 %v245_v29  ;;  %v199_v26 = vld [vmem:[%s1066_s13 + $0xa0] sm:$0xff]  ;;  %v202_v28 = vld [vmem:[%s1066_s13 + $0xb8] sm:$0xff] }
  0x2a   : > { %430 = vmatprep.subr.mxu0 %v244_v30  ;;  %841 = vmatprep.subr.mxu1 %v244_v30  ;;  %v231_v27 = vld [vmem:[%s1066_s13 + $0x1a0] sm:$0xff]  ;;  %v234_v29 = vld [vmem:[%s1066_s13 + $0x1b8] sm:$0xff]  ;;  %v201_v30 = vld [vmem:[%s1066_s13 + $0xb0] sm:$0xff] }
  0x2b   : > { %431 = vmatpush1.msra.mxu0 %v243_v31  ;;  %865 = vmatpush1.msra.mxu1 %v243_v31  ;;  %v233_v31 = vld [vmem:[%s1066_s13 + $0x1b0] sm:$0xff] }
  0x2c   : > { %448 = vmatprep.subr.mxu0 %v290_v32  ;;  %842 = vmatprep.subr.mxu1 %v290_v32  ;;  %v204_v32 = vld [vmem:[%s1066_s13 + $0xc8] sm:$0xff] }
  0x2d   : > { %449 = vmatpush2.msra.mxu0 %v289_v33  ;;  %866 = vmatpush2.msra.mxu1 %v289_v33  ;;  %v236_v33 = vld [vmem:[%s1066_s13 + $0x1c8] sm:$0xff] }
  0x2e   : > { %450 = vmatprep.subr.mxu0 %v288_v34  ;;  %843 = vmatprep.subr.mxu1 %v288_v34  ;;  %v203_v34 = vld [vmem:[%s1066_s13 + $0xc0] sm:$0xff] }
  0x2f   : > { %451 = vmatpush2.msra.mxu0 %v287_v35  ;;  %867 = vmatpush2.msra.mxu1 %v287_v35  ;;  %v235_v35 = vld [vmem:[%s1066_s13 + $0x1c0] sm:$0xff] }
  0x30   : > { %452 = vmatprep.subr.mxu0 %v286_v36  ;;  %844 = vmatprep.subr.mxu1 %v286_v36  ;;  %v206_v36 = vld [vmem:[%s1066_s13 + $0xd8] sm:$0xff] }
  0x31   : > { %453 = vmatpush2.msra.mxu0 %v285_v37  ;;  %868 = vmatpush2.msra.mxu1 %v285_v37  ;;  %v238_v37 = vld [vmem:[%s1066_s13 + $0x1d8] sm:$0xff] }
  0x32   : > { %454 = vmatprep.subr.mxu0 %v284_v38  ;;  %845 = vmatprep.subr.mxu1 %v284_v38  ;;  %v205_v38 = vld [vmem:[%s1066_s13 + $0xd0] sm:$0xff] }
  0x33   : > { %455 = vmatpush2.msra.mxu0 %v283_v39  ;;  %869 = vmatpush2.msra.mxu1 %v283_v39  ;;  %v237_v39 = vld [vmem:[%s1066_s13 + $0x1d0] sm:$0xff] }
  0x34   : > { %456 = vmatprep.subr.mxu0 %v282_v40  ;;  %846 = vmatprep.subr.mxu1 %v282_v40  ;;  %v208_v40 = vld [vmem:[%s1066_s13 + $0xe8] sm:$0xff] }
  0x35   : > { %457 = vmatpush2.msra.mxu0 %v281_v41  ;;  %870 = vmatpush2.msra.mxu1 %v281_v41  ;;  %v240_v41 = vld [vmem:[%s1066_s13 + $0x1e8] sm:$0xff] }
  0x36   : > { %458 = vmatprep.subr.mxu0 %v280_v42  ;;  %847 = vmatprep.subr.mxu1 %v280_v42  ;;  %v207_v42 = vld [vmem:[%s1066_s13 + $0xe0] sm:$0xff] }
  0x37   : > { %459 = vmatpush2.msra.mxu0 %v279_v43  ;;  %871 = vmatpush2.msra.mxu1 %v279_v43  ;;  %v239_v43 = vld [vmem:[%s1066_s13 + $0x1e0] sm:$0xff] }
  0x38   : > { %460 = vmatprep.subr.mxu0 %v278_v44  ;;  %848 = vmatprep.subr.mxu1 %v278_v44  ;;  %v210_v44 = vld [vmem:[%s1066_s13 + $0xf8] sm:$0xff] }
  0x39   : > { %461 = vmatpush2.msra.mxu0 %v277_v45  ;;  %872 = vmatpush2.msra.mxu1 %v277_v45  ;;  %v242_v45 = vld [vmem:[%s1066_s13 + $0x1f8] sm:$0xff] }
  0x3a   : > { %462 = vmatprep.subr.mxu0 %v276_v46  ;;  %849 = vmatprep.subr.mxu1 %v276_v46  ;;  %v209_v46 = vld [vmem:[%s1066_s13 + $0xf0] sm:$0xff] }
  0x3b   : > { %463 = vmatpush2.msra.mxu0 %v275_v47  ;;  %873 = vmatpush2.msra.mxu1 %v275_v47  ;;  %v241_v47 = vld [vmem:[%s1066_s13 + $0x1f0] sm:$0xff] }
  0x3c   : > { %790 = vmatprep.mubr.msk.f32.mxu0 %vm303_vm0, %v180_v48  ;;  %806 = vmatprep.mubr.msk.f32.mxu1 %vm303_vm0, %v212_v49  ;;  %v293_v48 = vlaneseq }
  0x3d   : > { %465 = vmatmul.mubr.f32.vlgmr.msra.gmra.mxu0 %v179_v50  ;;  %561 = vmatmul.mubr.f32.vlgmr.msra.gmra.mxu1 %v211_v51  ;;  %v291_v51 = vld [vmem:[%s1317_s2] sm:$0x3] }
  0x3e   : > { %791 = vmatprep.mubr.msk.f32.mxu0 %vm303_vm0, %v182_v52  ;;  %807 = vmatprep.mubr.msk.f32.mxu1 %vm303_vm0, %v214_v53  ;;  %v294_v49 = vshrl.u32 %v293_v48, 7 }
  0x40   : > { %v295_v50 = vsub.s32 0, %v294_v49  ;;  %v299_v52 = vsub.s32 1, %v294_v49 }
  0x41   : > { %471 = vmatmul.mubr.f32.gmra.mxu0 %v181_v54  ;;  %567 = vmatmul.mubr.f32.gmra.mxu1 %v213_v55 }
  0x42   : > { %792 = vmatprep.mubr.msk.f32.mxu0 %vm303_vm0, %v184_v56  ;;  %808 = vmatprep.mubr.msk.f32.mxu1 %vm303_vm0, %v216_v57  ;;  %v1173_v53 = vrot.slane %v291_v51, %v295_v50  ;;  %v1175_v54 = vrot.slane %v291_v51, %v299_v52 }
  0x45   : > { %477 = vmatmul.mubr.f32.gmra.mxu0 %v183_v58  ;;  %573 = vmatmul.mubr.f32.gmra.mxu1 %v215_v59 }
  0x46   : > { %793 = vmatprep.mubr.msk.f32.mxu0 %vm303_vm0, %v186_v60  ;;  %809 = vmatprep.mubr.msk.f32.mxu1 %vm303_vm0, %v218_v61 }
  0x49   : > { %483 = vmatmul.mubr.f32.gmra.mxu0 %v185_v62  ;;  %579 = vmatmul.mubr.f32.gmra.mxu1 %v217_v63 }
  0x4a   : > { %794 = vmatprep.mubr.msk.f32.mxu0 %vm303_vm0, %v188_v0  ;;  %810 = vmatprep.mubr.msk.f32.mxu1 %vm303_vm0, %v220_v1 }
  0x4d   : > { %489 = vmatmul.mubr.f32.gmra.mxu0 %v187_v2  ;;  %585 = vmatmul.mubr.f32.gmra.mxu1 %v219_v3 }
  0x4e   : > { %795 = vmatprep.mubr.msk.f32.mxu0 %vm303_vm0, %v190_v4  ;;  %811 = vmatprep.mubr.msk.f32.mxu1 %vm303_vm0, %v222_v5 }
  0x51   : > { %495 = vmatmul.mubr.f32.gmra.mxu0 %v189_v6  ;;  %591 = vmatmul.mubr.f32.gmra.mxu1 %v221_v7 }
  0x52   : > { %796 = vmatprep.mubr.msk.f32.mxu0 %vm303_vm0, %v192_v8  ;;  %812 = vmatprep.mubr.msk.f32.mxu1 %vm303_vm0, %v224_v9 }
  0x55   : > { %501 = vmatmul.mubr.f32.gmra.mxu0 %v191_v10  ;;  %597 = vmatmul.mubr.f32.gmra.mxu1 %v223_v11 }
  0x56   : > { %797 = vmatprep.mubr.msk.f32.mxu0 %vm303_vm0, %v194_v12  ;;  %813 = vmatprep.mubr.msk.f32.mxu1 %vm303_vm0, %v226_v13 }
  0x59   : > { %507 = vmatmul.mubr.f32.gmra.mxu0 %v193_v14  ;;  %603 = vmatmul.mubr.f32.gmra.mxu1 %v225_v15 }
  0x5a   : > { %798 = vmatprep.mubr.msk.f32.mxu0 %vm303_vm0, %v196_v16  ;;  %814 = vmatprep.mubr.msk.f32.mxu1 %vm303_vm0, %v228_v17 }
  0x5d   : > { %513 = vmatmul.mubr.f32.gmra.mxu0 %v195_v18  ;;  %609 = vmatmul.mubr.f32.gmra.mxu1 %v227_v19 }
  0x5e   : > { %799 = vmatprep.mubr.msk.f32.mxu0 %vm303_vm0, %v198_v20  ;;  %815 = vmatprep.mubr.msk.f32.mxu1 %vm303_vm0, %v230_v21 }
  0x61   : > { %519 = vmatmul.mubr.f32.gmra.mxu0 %v197_v22  ;;  %615 = vmatmul.mubr.f32.gmra.mxu1 %v229_v23 }
  0x62   : > { %800 = vmatprep.mubr.msk.f32.mxu0 %vm303_vm0, %v200_v24  ;;  %816 = vmatprep.mubr.msk.f32.mxu1 %vm303_vm0, %v232_v25 }
  0x65   : > { %525 = vmatmul.mubr.f32.gmra.mxu0 %v199_v26  ;;  %621 = vmatmul.mubr.f32.gmra.mxu1 %v231_v27 }
  0x66   : > { %801 = vmatprep.mubr.msk.f32.mxu0 %vm303_vm0, %v202_v28  ;;  %817 = vmatprep.mubr.msk.f32.mxu1 %vm303_vm0, %v234_v29 }
  0x69   : > { %531 = vmatmul.mubr.f32.gmra.mxu0 %v201_v30  ;;  %627 = vmatmul.mubr.f32.gmra.mxu1 %v233_v31 }
  0x6a   : > { %802 = vmatprep.mubr.msk.f32.mxu0 %vm303_vm0, %v204_v32  ;;  %818 = vmatprep.mubr.msk.f32.mxu1 %vm303_vm0, %v236_v33 }
  0x6d   : > { %537 = vmatmul.mubr.f32.gmra.mxu0 %v203_v34  ;;  %633 = vmatmul.mubr.f32.gmra.mxu1 %v235_v35 }
  0x6e   : > { %803 = vmatprep.mubr.msk.f32.mxu0 %vm303_vm0, %v206_v36  ;;  %819 = vmatprep.mubr.msk.f32.mxu1 %vm303_vm0, %v238_v37 }
  0x71   : > { %543 = vmatmul.mubr.f32.gmra.mxu0 %v205_v38  ;;  %639 = vmatmul.mubr.f32.gmra.mxu1 %v237_v39 }
  0x72   : > { %804 = vmatprep.mubr.msk.f32.mxu0 %vm303_vm0, %v208_v40  ;;  %820 = vmatprep.mubr.msk.f32.mxu1 %vm303_vm0, %v240_v41 }
  0x75   : > { %549 = vmatmul.mubr.f32.gmra.mxu0 %v207_v42  ;;  %645 = vmatmul.mubr.f32.gmra.mxu1 %v239_v43 }
  0x76   : > { %805 = vmatprep.mubr.msk.f32.mxu0 %vm303_vm0, %v210_v44  ;;  %821 = vmatprep.mubr.msk.f32.mxu1 %vm303_vm0, %v242_v45 }
  0x79   : > { %555 = vmatmul.mubr.f32.gmra.mxu0 %v209_v46  ;;  %651 = vmatmul.mubr.f32.gmra.mxu1 %v241_v47 }
  0xfd   : > { %v466_v55 = vpop.f32.mrf.mxu0  ;;  %v562_v56 = vpop.f32.mrf.mxu1 }
  0xfe   : > { %v467_v57 = vadd.f32 %v466_v55, %v1173_v53  ;;  %v563_v58 = vadd.f32 %v562_v56, %v1173_v53 }
  0xff   : > { %v468_v59 = vpop.f32.mrf.mxu0  ;;  %v564_v60 = vpop.f32.mrf.mxu1 }
 0x100   : > { %657 = vst [vmem:[%s1182_s18] sm:$0xff] %v467_v57  ;;  %689 = vst [vmem:[%s1182_s18 + $0x100] sm:$0xff] %v563_v58  ;;  %v469_v61 = vadd.f32 %v468_v59, %v1175_v54  ;;  %v565_v62 = vadd.f32 %v564_v60, %v1175_v54 }
 0x101   : > { %v472_v63 = vpop.f32.mrf.mxu0  ;;  %v568_v0 = vpop.f32.mrf.mxu1 }
 0x102   : > { %658 = vst [vmem:[%s1182_s18 + $0x8] sm:$0xff] %v469_v61  ;;  %690 = vst [vmem:[%s1182_s18 + $0x108] sm:$0xff] %v565_v62  ;;  %v473_v1 = vadd.f32 %v472_v63, %v1173_v53  ;;  %v569_v2 = vadd.f32 %v568_v0, %v1173_v53 }
 0x103   : > { %v474_v3 = vpop.f32.mrf.mxu0  ;;  %v570_v4 = vpop.f32.mrf.mxu1 }
 0x104   : > { %659 = vst [vmem:[%s1182_s18 + $0x10] sm:$0xff] %v473_v1  ;;  %691 = vst [vmem:[%s1182_s18 + $0x110] sm:$0xff] %v569_v2  ;;  %v475_v5 = vadd.f32 %v474_v3, %v1175_v54  ;;  %v571_v6 = vadd.f32 %v570_v4, %v1175_v54 }
 0x105   : > { %v478_v7 = vpop.f32.mrf.mxu0  ;;  %v574_v8 = vpop.f32.mrf.mxu1 }
 0x106   : > { %660 = vst [vmem:[%s1182_s18 + $0x18] sm:$0xff] %v475_v5  ;;  %692 = vst [vmem:[%s1182_s18 + $0x118] sm:$0xff] %v571_v6  ;;  %v479_v9 = vadd.f32 %v478_v7, %v1173_v53  ;;  %v575_v10 = vadd.f32 %v574_v8, %v1173_v53 }
 0x107   : > { %v480_v11 = vpop.f32.mrf.mxu0  ;;  %v576_v12 = vpop.f32.mrf.mxu1 }
 0x108   : > { %661 = vst [vmem:[%s1182_s18 + $0x20] sm:$0xff] %v479_v9  ;;  %693 = vst [vmem:[%s1182_s18 + $0x120] sm:$0xff] %v575_v10  ;;  %v481_v13 = vadd.f32 %v480_v11, %v1175_v54  ;;  %v577_v14 = vadd.f32 %v576_v12, %v1175_v54 }
 0x109   : > { %v484_v15 = vpop.f32.mrf.mxu0  ;;  %v580_v16 = vpop.f32.mrf.mxu1 }
 0x10a   : > { %662 = vst [vmem:[%s1182_s18 + $0x28] sm:$0xff] %v481_v13  ;;  %694 = vst [vmem:[%s1182_s18 + $0x128] sm:$0xff] %v577_v14  ;;  %v485_v17 = vadd.f32 %v484_v15, %v1173_v53  ;;  %v581_v18 = vadd.f32 %v580_v16, %v1173_v53 }
 0x10b   : > { %v486_v19 = vpop.f32.mrf.mxu0  ;;  %v582_v20 = vpop.f32.mrf.mxu1 }
 0x10c   : > { %663 = vst [vmem:[%s1182_s18 + $0x30] sm:$0xff] %v485_v17  ;;  %695 = vst [vmem:[%s1182_s18 + $0x130] sm:$0xff] %v581_v18  ;;  %v487_v21 = vadd.f32 %v486_v19, %v1175_v54  ;;  %v583_v22 = vadd.f32 %v582_v20, %v1175_v54 }
 0x10d   : > { %v490_v23 = vpop.f32.mrf.mxu0  ;;  %v586_v24 = vpop.f32.mrf.mxu1 }
 0x10e   : > { %664 = vst [vmem:[%s1182_s18 + $0x38] sm:$0xff] %v487_v21  ;;  %696 = vst [vmem:[%s1182_s18 + $0x138] sm:$0xff] %v583_v22  ;;  %v491_v25 = vadd.f32 %v490_v23, %v1173_v53  ;;  %v587_v26 = vadd.f32 %v586_v24, %v1173_v53 }
 0x10f   : > { %v492_v27 = vpop.f32.mrf.mxu0  ;;  %v588_v28 = vpop.f32.mrf.mxu1 }
 0x110   : > { %665 = vst [vmem:[%s1182_s18 + $0x40] sm:$0xff] %v491_v25  ;;  %697 = vst [vmem:[%s1182_s18 + $0x140] sm:$0xff] %v587_v26  ;;  %v493_v29 = vadd.f32 %v492_v27, %v1175_v54  ;;  %v589_v30 = vadd.f32 %v588_v28, %v1175_v54 }
 0x111   : > { %v496_v31 = vpop.f32.mrf.mxu0  ;;  %v592_v32 = vpop.f32.mrf.mxu1 }
 0x112   : > { %666 = vst [vmem:[%s1182_s18 + $0x48] sm:$0xff] %v493_v29  ;;  %698 = vst [vmem:[%s1182_s18 + $0x148] sm:$0xff] %v589_v30  ;;  %v497_v33 = vadd.f32 %v496_v31, %v1173_v53  ;;  %v593_v34 = vadd.f32 %v592_v32, %v1173_v53 }
 0x113   : > { %v498_v35 = vpop.f32.mrf.mxu0  ;;  %v594_v36 = vpop.f32.mrf.mxu1 }
 0x114   : > { %667 = vst [vmem:[%s1182_s18 + $0x50] sm:$0xff] %v497_v33  ;;  %699 = vst [vmem:[%s1182_s18 + $0x150] sm:$0xff] %v593_v34  ;;  %v499_v37 = vadd.f32 %v498_v35, %v1175_v54  ;;  %v595_v38 = vadd.f32 %v594_v36, %v1175_v54 }
 0x115   : > { %v502_v39 = vpop.f32.mrf.mxu0  ;;  %v598_v40 = vpop.f32.mrf.mxu1 }
 0x116   : > { %668 = vst [vmem:[%s1182_s18 + $0x58] sm:$0xff] %v499_v37  ;;  %700 = vst [vmem:[%s1182_s18 + $0x158] sm:$0xff] %v595_v38  ;;  %v503_v41 = vadd.f32 %v502_v39, %v1173_v53  ;;  %v599_v42 = vadd.f32 %v598_v40, %v1173_v53 }
 0x117   : > { %v504_v43 = vpop.f32.mrf.mxu0  ;;  %v600_v44 = vpop.f32.mrf.mxu1 }
 0x118   : > { %669 = vst [vmem:[%s1182_s18 + $0x60] sm:$0xff] %v503_v41  ;;  %701 = vst [vmem:[%s1182_s18 + $0x160] sm:$0xff] %v599_v42  ;;  %v505_v45 = vadd.f32 %v504_v43, %v1175_v54  ;;  %v601_v46 = vadd.f32 %v600_v44, %v1175_v54 }
 0x119   : > { %v508_v47 = vpop.f32.mrf.mxu0  ;;  %v604_v48 = vpop.f32.mrf.mxu1 }
 0x11a   : > { %670 = vst [vmem:[%s1182_s18 + $0x68] sm:$0xff] %v505_v45  ;;  %702 = vst [vmem:[%s1182_s18 + $0x168] sm:$0xff] %v601_v46  ;;  %v509_v49 = vadd.f32 %v508_v47, %v1173_v53  ;;  %v605_v50 = vadd.f32 %v604_v48, %v1173_v53 }
 0x11b   : > { %v510_v51 = vpop.f32.mrf.mxu0  ;;  %v606_v52 = vpop.f32.mrf.mxu1 }
 0x11c   : > { %671 = vst [vmem:[%s1182_s18 + $0x70] sm:$0xff] %v509_v49  ;;  %703 = vst [vmem:[%s1182_s18 + $0x170] sm:$0xff] %v605_v50  ;;  %v511_v55 = vadd.f32 %v510_v51, %v1175_v54  ;;  %v607_v56 = vadd.f32 %v606_v52, %v1175_v54 }
 0x11d   : > { %v514_v57 = vpop.f32.mrf.mxu0  ;;  %v610_v58 = vpop.f32.mrf.mxu1 }
 0x11e   : > { %672 = vst [vmem:[%s1182_s18 + $0x78] sm:$0xff] %v511_v55  ;;  %704 = vst [vmem:[%s1182_s18 + $0x178] sm:$0xff] %v607_v56  ;;  %v515_v59 = vadd.f32 %v514_v57, %v1173_v53  ;;  %v611_v60 = vadd.f32 %v610_v58, %v1173_v53 }
 0x11f   : > { %v516_v61 = vpop.f32.mrf.mxu0  ;;  %v612_v62 = vpop.f32.mrf.mxu1 }
 0x120   : > { %673 = vst [vmem:[%s1182_s18 + $0x80] sm:$0xff] %v515_v59  ;;  %705 = vst [vmem:[%s1182_s18 + $0x180] sm:$0xff] %v611_v60  ;;  %v517_v63 = vadd.f32 %v516_v61, %v1175_v54  ;;  %v613_v0 = vadd.f32 %v612_v62, %v1175_v54 }
 0x121   : > { %v520_v1 = vpop.f32.mrf.mxu0  ;;  %v616_v2 = vpop.f32.mrf.mxu1 }
 0x122   : > { %674 = vst [vmem:[%s1182_s18 + $0x88] sm:$0xff] %v517_v63  ;;  %706 = vst [vmem:[%s1182_s18 + $0x188] sm:$0xff] %v613_v0  ;;  %v521_v3 = vadd.f32 %v520_v1, %v1173_v53  ;;  %v617_v4 = vadd.f32 %v616_v2, %v1173_v53 }
 0x123   : > { %v522_v5 = vpop.f32.mrf.mxu0  ;;  %v618_v6 = vpop.f32.mrf.mxu1 }
 0x124   : > { %675 = vst [vmem:[%s1182_s18 + $0x90] sm:$0xff] %v521_v3  ;;  %707 = vst [vmem:[%s1182_s18 + $0x190] sm:$0xff] %v617_v4  ;;  %v523_v7 = vadd.f32 %v522_v5, %v1175_v54  ;;  %v619_v8 = vadd.f32 %v618_v6, %v1175_v54 }
 0x125   : > { %v526_v9 = vpop.f32.mrf.mxu0  ;;  %v622_v10 = vpop.f32.mrf.mxu1 }
 0x126   : > { %676 = vst [vmem:[%s1182_s18 + $0x98] sm:$0xff] %v523_v7  ;;  %708 = vst [vmem:[%s1182_s18 + $0x198] sm:$0xff] %v619_v8  ;;  %v527_v11 = vadd.f32 %v526_v9, %v1173_v53  ;;  %v623_v12 = vadd.f32 %v622_v10, %v1173_v53 }
 0x127   : > { %v528_v13 = vpop.f32.mrf.mxu0  ;;  %v624_v14 = vpop.f32.mrf.mxu1 }
 0x128   : > { %677 = vst [vmem:[%s1182_s18 + $0xa0] sm:$0xff] %v527_v11  ;;  %709 = vst [vmem:[%s1182_s18 + $0x1a0] sm:$0xff] %v623_v12  ;;  %v529_v15 = vadd.f32 %v528_v13, %v1175_v54  ;;  %v625_v16 = vadd.f32 %v624_v14, %v1175_v54 }
 0x129   : > { %v532_v17 = vpop.f32.mrf.mxu0  ;;  %v628_v18 = vpop.f32.mrf.mxu1 }
 0x12a   : > { %678 = vst [vmem:[%s1182_s18 + $0xa8] sm:$0xff] %v529_v15  ;;  %710 = vst [vmem:[%s1182_s18 + $0x1a8] sm:$0xff] %v625_v16  ;;  %v533_v19 = vadd.f32 %v532_v17, %v1173_v53  ;;  %v629_v20 = vadd.f32 %v628_v18, %v1173_v53 }
 0x12b   : > { %v534_v21 = vpop.f32.mrf.mxu0  ;;  %v630_v22 = vpop.f32.mrf.mxu1 }
 0x12c   : > { %679 = vst [vmem:[%s1182_s18 + $0xb0] sm:$0xff] %v533_v19  ;;  %711 = vst [vmem:[%s1182_s18 + $0x1b0] sm:$0xff] %v629_v20  ;;  %v535_v23 = vadd.f32 %v534_v21, %v1175_v54  ;;  %v631_v24 = vadd.f32 %v630_v22, %v1175_v54 }
 0x12d   : > { %v538_v25 = vpop.f32.mrf.mxu0  ;;  %v634_v26 = vpop.f32.mrf.mxu1 }
 0x12e   : > { %680 = vst [vmem:[%s1182_s18 + $0xb8] sm:$0xff] %v535_v23  ;;  %712 = vst [vmem:[%s1182_s18 + $0x1b8] sm:$0xff] %v631_v24  ;;  %v539_v27 = vadd.f32 %v538_v25, %v1173_v53  ;;  %v635_v28 = vadd.f32 %v634_v26, %v1173_v53 }
 0x12f   : > { %v540_v29 = vpop.f32.mrf.mxu0  ;;  %v636_v30 = vpop.f32.mrf.mxu1 }
 0x130   : > { %681 = vst [vmem:[%s1182_s18 + $0xc0] sm:$0xff] %v539_v27  ;;  %713 = vst [vmem:[%s1182_s18 + $0x1c0] sm:$0xff] %v635_v28  ;;  %v541_v31 = vadd.f32 %v540_v29, %v1175_v54  ;;  %v637_v32 = vadd.f32 %v636_v30, %v1175_v54 }
 0x131   : > { %v544_v33 = vpop.f32.mrf.mxu0  ;;  %v640_v34 = vpop.f32.mrf.mxu1 }
 0x132   : > { %682 = vst [vmem:[%s1182_s18 + $0xc8] sm:$0xff] %v541_v31  ;;  %714 = vst [vmem:[%s1182_s18 + $0x1c8] sm:$0xff] %v637_v32  ;;  %v545_v35 = vadd.f32 %v544_v33, %v1173_v53  ;;  %v641_v36 = vadd.f32 %v640_v34, %v1173_v53 }
 0x133   : > { %v546_v37 = vpop.f32.mrf.mxu0  ;;  %v642_v38 = vpop.f32.mrf.mxu1 }
 0x134   : > { %683 = vst [vmem:[%s1182_s18 + $0xd0] sm:$0xff] %v545_v35  ;;  %715 = vst [vmem:[%s1182_s18 + $0x1d0] sm:$0xff] %v641_v36  ;;  %v547_v39 = vadd.f32 %v546_v37, %v1175_v54  ;;  %v643_v40 = vadd.f32 %v642_v38, %v1175_v54 }
 0x135   : > { %v550_v41 = vpop.f32.mrf.mxu0  ;;  %v646_v42 = vpop.f32.mrf.mxu1 }
 0x136   : > { %684 = vst [vmem:[%s1182_s18 + $0xd8] sm:$0xff] %v547_v39  ;;  %716 = vst [vmem:[%s1182_s18 + $0x1d8] sm:$0xff] %v643_v40  ;;  %v551_v43 = vadd.f32 %v550_v41, %v1173_v53  ;;  %v647_v44 = vadd.f32 %v646_v42, %v1173_v53 }
 0x137   : > { %v552_v45 = vpop.f32.mrf.mxu0  ;;  %v648_v46 = vpop.f32.mrf.mxu1 }
 0x138   : > { %685 = vst [vmem:[%s1182_s18 + $0xe0] sm:$0xff] %v551_v43  ;;  %717 = vst [vmem:[%s1182_s18 + $0x1e0] sm:$0xff] %v647_v44  ;;  %v553_v47 = vadd.f32 %v552_v45, %v1175_v54  ;;  %v649_v48 = vadd.f32 %v648_v46, %v1175_v54 }
 0x139   : > { %v556_v49 = vpop.f32.mrf.mxu0  ;;  %v652_v50 = vpop.f32.mrf.mxu1 }
 0x13a   : > { %686 = vst [vmem:[%s1182_s18 + $0xe8] sm:$0xff] %v553_v47  ;;  %718 = vst [vmem:[%s1182_s18 + $0x1e8] sm:$0xff] %v649_v48  ;;  %v557_v51 = vadd.f32 %v556_v49, %v1173_v53  ;;  %v653_v52 = vadd.f32 %v652_v50, %v1173_v53 }
 0x13b   : > { %v558_v55 = vpop.f32.mrf.mxu0  ;;  %v654_v56 = vpop.f32.mrf.mxu1 }
 0x13c   : > { %687 = vst [vmem:[%s1182_s18 + $0xf0] sm:$0xff] %v557_v51  ;;  %719 = vst [vmem:[%s1182_s18 + $0x1f0] sm:$0xff] %v653_v52  ;;  %v559_v57 = vadd.f32 %v558_v55, %v1175_v54  ;;  %v655_v58 = vadd.f32 %v654_v56, %v1175_v54 }
 0x13e   : > { %688 = vst [vmem:[%s1182_s18 + $0xf8] sm:$0xff] %v559_v57  ;;  %720 = vst [vmem:[%s1182_s18 + $0x1f8] sm:$0xff] %v655_v58 }
 0x13f PF: > { %s13_s12 = sadd.s32 1, %s888_s12  }
 0x140   : > { %p10_p4 = scmp.ge.s32.totalorder %s13_s12, 4  }
 0x142   :  { %12 = sbr.rel (!%p10_p4) target bundleno = 1 (0x1), region = 62 }

// kernel: direct_hb_head_forward.3
= control target key start
LH: loop header
LB: loop body
LE: loop exit
PB: predicated region body
PF: predicated region fallthrough
CT: control target
= control target key end

     0   :  { %vm130_vm0 = vcmask 261120   ;;  %s1251_s1 = inlined_call_operand.vmem [shape: f32[160,256], index: 1, kind: input, shape index: {}]   ;;  %s1252_s0 = inlined_call_operand.vmem [shape: f32[256,160], index: 0, kind: input, shape index: {}]   ;;  %s1253_s2 = inlined_call_operand.vmem [shape: f32[1,256], index: 2, kind: input, shape index: {}]   ;;  %s1254_s3 = inlined_call_operand.vmem [shape: f32[256,256], index: 3, kind: output, shape index: {}]  }
   0x1   :  { %v109_v0 = vld [vmem:[%s1251_s1 + $0xf8] sm:$0xff]  ;;  %v108_v1 = vld [vmem:[%s1251_s1 + $0xf0] sm:$0xff]  ;;  %v107_v2 = vld [vmem:[%s1251_s1 + $0xe8] sm:$0xff] }
   0x2   :  { %227 = vmatprep.subr.mxu0 %v109_v0  ;;  %584 = vmatprep.subr.mxu1 %v109_v0  ;;  %v106_v3 = vld [vmem:[%s1251_s1 + $0xe0] sm:$0xff]  ;;  %v105_v4 = vld [vmem:[%s1251_s1 + $0xd8] sm:$0xff]  ;;  %v104_v5 = vld [vmem:[%s1251_s1 + $0xd0] sm:$0xff] }
   0x3   :  { %228 = vmatpush1.msra.mxu0 %v108_v1  ;;  %604 = vmatpush1.msra.mxu1 %v108_v1  ;;  %v103_v6 = vld [vmem:[%s1251_s1 + $0xc8] sm:$0xff]  ;;  %v102_v7 = vld [vmem:[%s1251_s1 + $0xc0] sm:$0xff]  ;;  %v101_v8 = vld [vmem:[%s1251_s1 + $0xb8] sm:$0xff] }
   0x4   :  { %229 = vmatprep.subr.mxu0 %v107_v2  ;;  %585 = vmatprep.subr.mxu1 %v107_v2  ;;  %v100_v9 = vld [vmem:[%s1251_s1 + $0xb0] sm:$0xff]  ;;  %v99_v10 = vld [vmem:[%s1251_s1 + $0xa8] sm:$0xff]  ;;  %v98_v11 = vld [vmem:[%s1251_s1 + $0xa0] sm:$0xff] }
   0x5   :  { %230 = vmatpush1.msra.mxu0 %v106_v3  ;;  %605 = vmatpush1.msra.mxu1 %v106_v3  ;;  %v97_v12 = vld [vmem:[%s1251_s1 + $0x98] sm:$0xff]  ;;  %v96_v13 = vld [vmem:[%s1251_s1 + $0x90] sm:$0xff]  ;;  %v95_v14 = vld [vmem:[%s1251_s1 + $0x88] sm:$0xff] }
   0x6   :  { %231 = vmatprep.subr.mxu0 %v105_v4  ;;  %586 = vmatprep.subr.mxu1 %v105_v4  ;;  %v94_v15 = vld [vmem:[%s1251_s1 + $0x80] sm:$0xff]  ;;  %v93_v16 = vld [vmem:[%s1251_s1 + $0x78] sm:$0xff]  ;;  %v92_v17 = vld [vmem:[%s1251_s1 + $0x70] sm:$0xff] }
   0x7   :  { %232 = vmatpush1.msra.mxu0 %v104_v5  ;;  %606 = vmatpush1.msra.mxu1 %v104_v5  ;;  %v91_v18 = vld [vmem:[%s1251_s1 + $0x68] sm:$0xff]  ;;  %v90_v19 = vld [vmem:[%s1251_s1 + $0x60] sm:$0xff]  ;;  %v89_v20 = vld [vmem:[%s1251_s1 + $0x58] sm:$0xff] }
   0x8   :  { %233 = vmatprep.subr.mxu0 %v103_v6  ;;  %587 = vmatprep.subr.mxu1 %v103_v6  ;;  %v88_v21 = vld [vmem:[%s1251_s1 + $0x50] sm:$0xff]  ;;  %v87_v22 = vld [vmem:[%s1251_s1 + $0x48] sm:$0xff]  ;;  %v86_v23 = vld [vmem:[%s1251_s1 + $0x40] sm:$0xff] }
   0x9   :  { %234 = vmatpush1.msra.mxu0 %v102_v7  ;;  %607 = vmatpush1.msra.mxu1 %v102_v7  ;;  %v85_v24 = vld [vmem:[%s1251_s1 + $0x38] sm:$0xff]  ;;  %v84_v25 = vld [vmem:[%s1251_s1 + $0x30] sm:$0xff]  ;;  %v83_v26 = vld [vmem:[%s1251_s1 + $0x28] sm:$0xff] }
   0xa   :  { %235 = vmatprep.subr.mxu0 %v101_v8  ;;  %588 = vmatprep.subr.mxu1 %v101_v8  ;;  %v82_v27 = vld [vmem:[%s1251_s1 + $0x20] sm:$0xff]  ;;  %v81_v28 = vld [vmem:[%s1251_s1 + $0x18] sm:$0xff]  ;;  %v80_v29 = vld [vmem:[%s1251_s1 + $0x10] sm:$0xff] }
   0xb   :  { %236 = vmatpush1.msra.mxu0 %v100_v9  ;;  %608 = vmatpush1.msra.mxu1 %v100_v9  ;;  %v79_v30 = vld [vmem:[%s1251_s1 + $0x8] sm:$0xff]  ;;  %v78_v31 = vld [vmem:[%s1251_s1] sm:$0xff]  ;;  %v117_v32 = vld [vmem:[%s1251_s1 + $0x138] sm:$0xff] }
   0xc   :  { %237 = vmatprep.subr.mxu0 %v99_v10  ;;  %589 = vmatprep.subr.mxu1 %v99_v10  ;;  %v116_v33 = vld [vmem:[%s1251_s1 + $0x130] sm:$0xff]  ;;  %v115_v34 = vld [vmem:[%s1251_s1 + $0x128] sm:$0xff]  ;;  %v114_v35 = vld [vmem:[%s1251_s1 + $0x120] sm:$0xff] }
   0xd   :  { %238 = vmatpush1.msra.mxu0 %v98_v11  ;;  %609 = vmatpush1.msra.mxu1 %v98_v11  ;;  %v113_v36 = vld [vmem:[%s1251_s1 + $0x118] sm:$0xff]  ;;  %v112_v37 = vld [vmem:[%s1251_s1 + $0x110] sm:$0xff]  ;;  %v111_v38 = vld [vmem:[%s1251_s1 + $0x108] sm:$0xff] }
   0xe   :  { %239 = vmatprep.subr.mxu0 %v97_v12  ;;  %590 = vmatprep.subr.mxu1 %v97_v12  ;;  %v110_v39 = vld [vmem:[%s1251_s1 + $0x100] sm:$0xff]  ;;  %v15_v40 = vld [vmem:[%s1252_s0 + $0x8] sm:$0xff]  ;;  %v17_v44 = vld [vmem:[%s1252_s0 + $0x18] sm:$0xff] }
   0xf   :  { %240 = vmatpush1.msra.mxu0 %v96_v13  ;;  %610 = vmatpush1.msra.mxu1 %v96_v13  ;;  %v47_v41 = vld [vmem:[%s1252_s0 + $0x108] sm:$0xff]  ;;  %v14_v42 = vld [vmem:[%s1252_s0] sm:$0xff]  ;;  %v49_v45 = vld [vmem:[%s1252_s0 + $0x118] sm:$0xff] }
  0x10   :  { %241 = vmatprep.subr.mxu0 %v95_v14  ;;  %591 = vmatprep.subr.mxu1 %v95_v14  ;;  %v46_v43 = vld [vmem:[%s1252_s0 + $0x100] sm:$0xff]  ;;  %v16_v46 = vld [vmem:[%s1252_s0 + $0x10] sm:$0xff]  ;;  %v19_v48 = vld [vmem:[%s1252_s0 + $0x28] sm:$0xff] }
  0x11   :  { %242 = vmatpush1.msra.mxu0 %v94_v15  ;;  %611 = vmatpush1.msra.mxu1 %v94_v15  ;;  %v48_v47 = vld [vmem:[%s1252_s0 + $0x110] sm:$0xff]  ;;  %v51_v49 = vld [vmem:[%s1252_s0 + $0x128] sm:$0xff]  ;;  %v18_v50 = vld [vmem:[%s1252_s0 + $0x20] sm:$0xff] }
  0x12   :  { %243 = vmatprep.subr.mxu0 %v93_v16  ;;  %592 = vmatprep.subr.mxu1 %v93_v16  ;;  %v50_v51 = vld [vmem:[%s1252_s0 + $0x120] sm:$0xff]  ;;  %v21_v52 = vld [vmem:[%s1252_s0 + $0x38] sm:$0xff]  ;;  %v20_v54 = vld [vmem:[%s1252_s0 + $0x30] sm:$0xff] }
  0x13   :  { %244 = vmatpush1.msra.mxu0 %v92_v17  ;;  %612 = vmatpush1.msra.mxu1 %v92_v17  ;;  %v53_v53 = vld [vmem:[%s1252_s0 + $0x138] sm:$0xff]  ;;  %v52_v55 = vld [vmem:[%s1252_s0 + $0x130] sm:$0xff]  ;;  %v23_v56 = vld [vmem:[%s1252_s0 + $0x48] sm:$0xff] }
  0x14   :  { %245 = vmatprep.subr.mxu0 %v91_v18  ;;  %593 = vmatprep.subr.mxu1 %v91_v18  ;;  %v55_v57 = vld [vmem:[%s1252_s0 + $0x148] sm:$0xff]  ;;  %v22_v58 = vld [vmem:[%s1252_s0 + $0x40] sm:$0xff]  ;;  %v25_v60 = vld [vmem:[%s1252_s0 + $0x58] sm:$0xff] }
  0x15   :  { %246 = vmatpush1.msra.mxu0 %v90_v19  ;;  %613 = vmatpush1.msra.mxu1 %v90_v19  ;;  %v54_v59 = vld [vmem:[%s1252_s0 + $0x140] sm:$0xff]  ;;  %v57_v61 = vld [vmem:[%s1252_s0 + $0x158] sm:$0xff]  ;;  %v24_v62 = vld [vmem:[%s1252_s0 + $0x50] sm:$0xff] }
  0x16   :  { %247 = vmatprep.subr.mxu0 %v89_v20  ;;  %594 = vmatprep.subr.mxu1 %v89_v20  ;;  %v56_v63 = vld [vmem:[%s1252_s0 + $0x150] sm:$0xff]  ;;  %v27_v0 = vld [vmem:[%s1252_s0 + $0x68] sm:$0xff]  ;;  %v26_v2 = vld [vmem:[%s1252_s0 + $0x60] sm:$0xff] }
  0x17   :  { %248 = vmatpush1.msra.mxu0 %v88_v21  ;;  %614 = vmatpush1.msra.mxu1 %v88_v21  ;;  %v59_v1 = vld [vmem:[%s1252_s0 + $0x168] sm:$0xff]  ;;  %v58_v3 = vld [vmem:[%s1252_s0 + $0x160] sm:$0xff]  ;;  %v29_v4 = vld [vmem:[%s1252_s0 + $0x78] sm:$0xff] }
  0x18   :  { %249 = vmatprep.subr.mxu0 %v87_v22  ;;  %595 = vmatprep.subr.mxu1 %v87_v22  ;;  %v61_v5 = vld [vmem:[%s1252_s0 + $0x178] sm:$0xff]  ;;  %v28_v6 = vld [vmem:[%s1252_s0 + $0x70] sm:$0xff]  ;;  %v31_v8 = vld [vmem:[%s1252_s0 + $0x88] sm:$0xff] }
  0x19   :  { %250 = vmatpush1.msra.mxu0 %v86_v23  ;;  %615 = vmatpush1.msra.mxu1 %v86_v23  ;;  %v60_v7 = vld [vmem:[%s1252_s0 + $0x170] sm:$0xff]  ;;  %v63_v9 = vld [vmem:[%s1252_s0 + $0x188] sm:$0xff]  ;;  %v30_v10 = vld [vmem:[%s1252_s0 + $0x80] sm:$0xff] }
  0x1a   :  { %251 = vmatprep.subr.mxu0 %v85_v24  ;;  %596 = vmatprep.subr.mxu1 %v85_v24  ;;  %v62_v11 = vld [vmem:[%s1252_s0 + $0x180] sm:$0xff]  ;;  %v33_v12 = vld [vmem:[%s1252_s0 + $0x98] sm:$0xff]  ;;  %v32_v14 = vld [vmem:[%s1252_s0 + $0x90] sm:$0xff] }
  0x1b   :  { %252 = vmatpush1.msra.mxu0 %v84_v25  ;;  %616 = vmatpush1.msra.mxu1 %v84_v25  ;;  %v65_v13 = vld [vmem:[%s1252_s0 + $0x198] sm:$0xff]  ;;  %v64_v15 = vld [vmem:[%s1252_s0 + $0x190] sm:$0xff]  ;;  %v35_v16 = vld [vmem:[%s1252_s0 + $0xa8] sm:$0xff] }
  0x1c   :  { %253 = vmatprep.subr.mxu0 %v83_v26  ;;  %597 = vmatprep.subr.mxu1 %v83_v26  ;;  %v67_v17 = vld [vmem:[%s1252_s0 + $0x1a8] sm:$0xff]  ;;  %v34_v18 = vld [vmem:[%s1252_s0 + $0xa0] sm:$0xff]  ;;  %v37_v20 = vld [vmem:[%s1252_s0 + $0xb8] sm:$0xff] }
  0x1d   :  { %254 = vmatpush1.msra.mxu0 %v82_v27  ;;  %617 = vmatpush1.msra.mxu1 %v82_v27  ;;  %v66_v19 = vld [vmem:[%s1252_s0 + $0x1a0] sm:$0xff]  ;;  %v69_v21 = vld [vmem:[%s1252_s0 + $0x1b8] sm:$0xff]  ;;  %v36_v22 = vld [vmem:[%s1252_s0 + $0xb0] sm:$0xff] }
  0x1e   :  { %255 = vmatprep.subr.mxu0 %v81_v28  ;;  %598 = vmatprep.subr.mxu1 %v81_v28  ;;  %v68_v23 = vld [vmem:[%s1252_s0 + $0x1b0] sm:$0xff]  ;;  %v39_v24 = vld [vmem:[%s1252_s0 + $0xc8] sm:$0xff]  ;;  %v38_v26 = vld [vmem:[%s1252_s0 + $0xc0] sm:$0xff] }
  0x1f   :  { %256 = vmatpush1.msra.mxu0 %v80_v29  ;;  %618 = vmatpush1.msra.mxu1 %v80_v29  ;;  %v71_v25 = vld [vmem:[%s1252_s0 + $0x1c8] sm:$0xff]  ;;  %v70_v27 = vld [vmem:[%s1252_s0 + $0x1c0] sm:$0xff]  ;;  %v41_v28 = vld [vmem:[%s1252_s0 + $0xd8] sm:$0xff] }
  0x20   :  { %257 = vmatprep.subr.mxu0 %v79_v30  ;;  %599 = vmatprep.subr.mxu1 %v79_v30  ;;  %v73_v29 = vld [vmem:[%s1252_s0 + $0x1d8] sm:$0xff]  ;;  %v40_v30 = vld [vmem:[%s1252_s0 + $0xd0] sm:$0xff] }
  0x21   :  { %258 = vmatpush1.msra.mxu0 %v78_v31  ;;  %619 = vmatpush1.msra.mxu1 %v78_v31  ;;  %v72_v31 = vld [vmem:[%s1252_s0 + $0x1d0] sm:$0xff] }
  0x22   :  { %283 = vmatprep.subr.mxu0 %v117_v32  ;;  %600 = vmatprep.subr.mxu1 %v117_v32  ;;  %v43_v32 = vld [vmem:[%s1252_s0 + $0xe8] sm:$0xff] }
  0x23   :  { %284 = vmatpush2.msra.mxu0 %v116_v33  ;;  %620 = vmatpush2.msra.mxu1 %v116_v33  ;;  %v75_v33 = vld [vmem:[%s1252_s0 + $0x1e8] sm:$0xff] }
  0x24   :  { %285 = vmatprep.subr.mxu0 %v115_v34  ;;  %601 = vmatprep.subr.mxu1 %v115_v34  ;;  %v42_v34 = vld [vmem:[%s1252_s0 + $0xe0] sm:$0xff] }
  0x25   :  { %286 = vmatpush2.msra.mxu0 %v114_v35  ;;  %621 = vmatpush2.msra.mxu1 %v114_v35  ;;  %v74_v35 = vld [vmem:[%s1252_s0 + $0x1e0] sm:$0xff] }
  0x26   :  { %287 = vmatprep.subr.mxu0 %v113_v36  ;;  %602 = vmatprep.subr.mxu1 %v113_v36  ;;  %v45_v36 = vld [vmem:[%s1252_s0 + $0xf8] sm:$0xff] }
  0x27   :  { %288 = vmatpush2.msra.mxu0 %v112_v37  ;;  %622 = vmatpush2.msra.mxu1 %v112_v37  ;;  %v77_v37 = vld [vmem:[%s1252_s0 + $0x1f8] sm:$0xff] }
  0x28   :  { %289 = vmatprep.subr.mxu0 %v111_v38  ;;  %603 = vmatprep.subr.mxu1 %v111_v38  ;;  %v44_v38 = vld [vmem:[%s1252_s0 + $0xf0] sm:$0xff] }
  0x29   :  { %290 = vmatpush2.msra.mxu0 %v110_v39  ;;  %623 = vmatpush2.msra.mxu1 %v110_v39  ;;  %v76_v39 = vld [vmem:[%s1252_s0 + $0x1f0] sm:$0xff] }
  0x2a   :  { %552 = vmatprep.mubr.msk.f32.mxu0 %vm130_vm0, %v15_v40  ;;  %568 = vmatprep.mubr.msk.f32.mxu1 %vm130_vm0, %v47_v41  ;;  %v120_v40 = vlaneseq }
  0x2b   :  { %292 = vmatmul.mubr.f32.vlgmr.msra.gmra.mxu0 %v14_v42  ;;  %388 = vmatmul.mubr.f32.vlgmr.msra.gmra.mxu1 %v46_v43  ;;  %v118_v43 = vld [vmem:[%s1253_s2] sm:$0x3] }
  0x2c   :  { %553 = vmatprep.mubr.msk.f32.mxu0 %vm130_vm0, %v17_v44  ;;  %569 = vmatprep.mubr.msk.f32.mxu1 %vm130_vm0, %v49_v45  ;;  %v121_v41 = vshrl.u32 %v120_v40, 7 }
  0x2e   :  { %v122_v42 = vsub.s32 0, %v121_v41  ;;  %v126_v44 = vsub.s32 1, %v121_v41 }
  0x2f   :  { %298 = vmatmul.mubr.f32.gmra.mxu0 %v16_v46  ;;  %394 = vmatmul.mubr.f32.gmra.mxu1 %v48_v47 }
  0x30   :  { %554 = vmatprep.mubr.msk.f32.mxu0 %vm130_vm0, %v19_v48  ;;  %570 = vmatprep.mubr.msk.f32.mxu1 %vm130_vm0, %v51_v49  ;;  %v991_v45 = vrot.slane %v118_v43, %v122_v42  ;;  %v993_v46 = vrot.slane %v118_v43, %v126_v44 }
  0x33   :  { %304 = vmatmul.mubr.f32.gmra.mxu0 %v18_v50  ;;  %400 = vmatmul.mubr.f32.gmra.mxu1 %v50_v51 }
  0x34   :  { %555 = vmatprep.mubr.msk.f32.mxu0 %vm130_vm0, %v21_v52  ;;  %571 = vmatprep.mubr.msk.f32.mxu1 %vm130_vm0, %v53_v53 }
  0x37   :  { %310 = vmatmul.mubr.f32.gmra.mxu0 %v20_v54  ;;  %406 = vmatmul.mubr.f32.gmra.mxu1 %v52_v55 }
  0x38   :  { %556 = vmatprep.mubr.msk.f32.mxu0 %vm130_vm0, %v23_v56  ;;  %572 = vmatprep.mubr.msk.f32.mxu1 %vm130_vm0, %v55_v57 }
  0x3b   :  { %316 = vmatmul.mubr.f32.gmra.mxu0 %v22_v58  ;;  %412 = vmatmul.mubr.f32.gmra.mxu1 %v54_v59 }
  0x3c   :  { %557 = vmatprep.mubr.msk.f32.mxu0 %vm130_vm0, %v25_v60  ;;  %573 = vmatprep.mubr.msk.f32.mxu1 %vm130_vm0, %v57_v61 }
  0x3f   :  { %322 = vmatmul.mubr.f32.gmra.mxu0 %v24_v62  ;;  %418 = vmatmul.mubr.f32.gmra.mxu1 %v56_v63 }
  0x40   :  { %558 = vmatprep.mubr.msk.f32.mxu0 %vm130_vm0, %v27_v0  ;;  %574 = vmatprep.mubr.msk.f32.mxu1 %vm130_vm0, %v59_v1 }
  0x43   :  { %328 = vmatmul.mubr.f32.gmra.mxu0 %v26_v2  ;;  %424 = vmatmul.mubr.f32.gmra.mxu1 %v58_v3 }
  0x44   :  { %559 = vmatprep.mubr.msk.f32.mxu0 %vm130_vm0, %v29_v4  ;;  %575 = vmatprep.mubr.msk.f32.mxu1 %vm130_vm0, %v61_v5 }
  0x47   :  { %334 = vmatmul.mubr.f32.gmra.mxu0 %v28_v6  ;;  %430 = vmatmul.mubr.f32.gmra.mxu1 %v60_v7 }
  0x48   :  { %560 = vmatprep.mubr.msk.f32.mxu0 %vm130_vm0, %v31_v8  ;;  %576 = vmatprep.mubr.msk.f32.mxu1 %vm130_vm0, %v63_v9 }
  0x4b   :  { %340 = vmatmul.mubr.f32.gmra.mxu0 %v30_v10  ;;  %436 = vmatmul.mubr.f32.gmra.mxu1 %v62_v11 }
  0x4c   :  { %561 = vmatprep.mubr.msk.f32.mxu0 %vm130_vm0, %v33_v12  ;;  %577 = vmatprep.mubr.msk.f32.mxu1 %vm130_vm0, %v65_v13 }
  0x4f   :  { %346 = vmatmul.mubr.f32.gmra.mxu0 %v32_v14  ;;  %442 = vmatmul.mubr.f32.gmra.mxu1 %v64_v15 }
  0x50   :  { %562 = vmatprep.mubr.msk.f32.mxu0 %vm130_vm0, %v35_v16  ;;  %578 = vmatprep.mubr.msk.f32.mxu1 %vm130_vm0, %v67_v17 }
  0x53   :  { %352 = vmatmul.mubr.f32.gmra.mxu0 %v34_v18  ;;  %448 = vmatmul.mubr.f32.gmra.mxu1 %v66_v19 }
  0x54   :  { %563 = vmatprep.mubr.msk.f32.mxu0 %vm130_vm0, %v37_v20  ;;  %579 = vmatprep.mubr.msk.f32.mxu1 %vm130_vm0, %v69_v21 }
  0x57   :  { %358 = vmatmul.mubr.f32.gmra.mxu0 %v36_v22  ;;  %454 = vmatmul.mubr.f32.gmra.mxu1 %v68_v23 }
  0x58   :  { %564 = vmatprep.mubr.msk.f32.mxu0 %vm130_vm0, %v39_v24  ;;  %580 = vmatprep.mubr.msk.f32.mxu1 %vm130_vm0, %v71_v25 }
  0x5b   :  { %364 = vmatmul.mubr.f32.gmra.mxu0 %v38_v26  ;;  %460 = vmatmul.mubr.f32.gmra.mxu1 %v70_v27 }
  0x5c   :  { %565 = vmatprep.mubr.msk.f32.mxu0 %vm130_vm0, %v41_v28  ;;  %581 = vmatprep.mubr.msk.f32.mxu1 %vm130_vm0, %v73_v29 }
  0x5f   :  { %370 = vmatmul.mubr.f32.gmra.mxu0 %v40_v30  ;;  %466 = vmatmul.mubr.f32.gmra.mxu1 %v72_v31 }
  0x60   :  { %566 = vmatprep.mubr.msk.f32.mxu0 %vm130_vm0, %v43_v32  ;;  %582 = vmatprep.mubr.msk.f32.mxu1 %vm130_vm0, %v75_v33 }
  0x63   :  { %376 = vmatmul.mubr.f32.gmra.mxu0 %v42_v34  ;;  %472 = vmatmul.mubr.f32.gmra.mxu1 %v74_v35 }
  0x64   :  { %567 = vmatprep.mubr.msk.f32.mxu0 %vm130_vm0, %v45_v36  ;;  %583 = vmatprep.mubr.msk.f32.mxu1 %vm130_vm0, %v77_v37 }
  0x67   :  { %382 = vmatmul.mubr.f32.gmra.mxu0 %v44_v38  ;;  %478 = vmatmul.mubr.f32.gmra.mxu1 %v76_v39 }
  0xeb   :  { %v293_v47 = vpop.f32.mrf.mxu0  ;;  %v389_v48 = vpop.f32.mrf.mxu1 }
  0xec   :  { %v294_v49 = vadd.f32 %v293_v47, %v991_v45  ;;  %v390_v50 = vadd.f32 %v389_v48, %v991_v45 }
  0xed   :  { %v295_v51 = vpop.f32.mrf.mxu0  ;;  %v391_v52 = vpop.f32.mrf.mxu1 }
  0xee   :  { %484 = vst [vmem:[%s1254_s3] sm:$0xff] %v294_v49  ;;  %516 = vst [vmem:[%s1254_s3 + $0x100] sm:$0xff] %v390_v50  ;;  %v296_v53 = vadd.f32 %v295_v51, %v993_v46  ;;  %v392_v54 = vadd.f32 %v391_v52, %v993_v46 }
  0xef   :  { %v299_v55 = vpop.f32.mrf.mxu0  ;;  %v395_v56 = vpop.f32.mrf.mxu1 }
  0xf0   :  { %485 = vst [vmem:[%s1254_s3 + $0x8] sm:$0xff] %v296_v53  ;;  %517 = vst [vmem:[%s1254_s3 + $0x108] sm:$0xff] %v392_v54  ;;  %v300_v57 = vadd.f32 %v299_v55, %v991_v45  ;;  %v396_v58 = vadd.f32 %v395_v56, %v991_v45 }
  0xf1   :  { %v301_v59 = vpop.f32.mrf.mxu0  ;;  %v397_v60 = vpop.f32.mrf.mxu1 }
  0xf2   :  { %486 = vst [vmem:[%s1254_s3 + $0x10] sm:$0xff] %v300_v57  ;;  %518 = vst [vmem:[%s1254_s3 + $0x110] sm:$0xff] %v396_v58  ;;  %v302_v61 = vadd.f32 %v301_v59, %v993_v46  ;;  %v398_v62 = vadd.f32 %v397_v60, %v993_v46 }
  0xf3   :  { %v305_v63 = vpop.f32.mrf.mxu0  ;;  %v401_v0 = vpop.f32.mrf.mxu1 }
  0xf4   :  { %487 = vst [vmem:[%s1254_s3 + $0x18] sm:$0xff] %v302_v61  ;;  %519 = vst [vmem:[%s1254_s3 + $0x118] sm:$0xff] %v398_v62  ;;  %v306_v1 = vadd.f32 %v305_v63, %v991_v45  ;;  %v402_v2 = vadd.f32 %v401_v0, %v991_v45 }
  0xf5   :  { %v307_v3 = vpop.f32.mrf.mxu0  ;;  %v403_v4 = vpop.f32.mrf.mxu1 }
  0xf6   :  { %488 = vst [vmem:[%s1254_s3 + $0x20] sm:$0xff] %v306_v1  ;;  %520 = vst [vmem:[%s1254_s3 + $0x120] sm:$0xff] %v402_v2  ;;  %v308_v5 = vadd.f32 %v307_v3, %v993_v46  ;;  %v404_v6 = vadd.f32 %v403_v4, %v993_v46 }
  0xf7   :  { %v311_v7 = vpop.f32.mrf.mxu0  ;;  %v407_v8 = vpop.f32.mrf.mxu1 }
  0xf8   :  { %489 = vst [vmem:[%s1254_s3 + $0x28] sm:$0xff] %v308_v5  ;;  %521 = vst [vmem:[%s1254_s3 + $0x128] sm:$0xff] %v404_v6  ;;  %v312_v9 = vadd.f32 %v311_v7, %v991_v45  ;;  %v408_v10 = vadd.f32 %v407_v8, %v991_v45 }
  0xf9   :  { %v313_v11 = vpop.f32.mrf.mxu0  ;;  %v409_v12 = vpop.f32.mrf.mxu1 }
  0xfa   :  { %490 = vst [vmem:[%s1254_s3 + $0x30] sm:$0xff] %v312_v9  ;;  %522 = vst [vmem:[%s1254_s3 + $0x130] sm:$0xff] %v408_v10  ;;  %v314_v13 = vadd.f32 %v313_v11, %v993_v46  ;;  %v410_v14 = vadd.f32 %v409_v12, %v993_v46 }
  0xfb   :  { %v317_v15 = vpop.f32.mrf.mxu0  ;;  %v413_v16 = vpop.f32.mrf.mxu1 }
  0xfc   :  { %491 = vst [vmem:[%s1254_s3 + $0x38] sm:$0xff] %v314_v13  ;;  %523 = vst [vmem:[%s1254_s3 + $0x138] sm:$0xff] %v410_v14  ;;  %v318_v17 = vadd.f32 %v317_v15, %v991_v45  ;;  %v414_v18 = vadd.f32 %v413_v16, %v991_v45 }
  0xfd   :  { %v319_v19 = vpop.f32.mrf.mxu0  ;;  %v415_v20 = vpop.f32.mrf.mxu1 }
  0xfe   :  { %492 = vst [vmem:[%s1254_s3 + $0x40] sm:$0xff] %v318_v17  ;;  %524 = vst [vmem:[%s1254_s3 + $0x140] sm:$0xff] %v414_v18  ;;  %v320_v21 = vadd.f32 %v319_v19, %v993_v46  ;;  %v416_v22 = vadd.f32 %v415_v20, %v993_v46 }
  0xff   :  { %v323_v23 = vpop.f32.mrf.mxu0  ;;  %v419_v24 = vpop.f32.mrf.mxu1 }
 0x100   :  { %493 = vst [vmem:[%s1254_s3 + $0x48] sm:$0xff] %v320_v21  ;;  %525 = vst [vmem:[%s1254_s3 + $0x148] sm:$0xff] %v416_v22  ;;  %v324_v25 = vadd.f32 %v323_v23, %v991_v45  ;;  %v420_v26 = vadd.f32 %v419_v24, %v991_v45 }
 0x101   :  { %v325_v27 = vpop.f32.mrf.mxu0  ;;  %v421_v28 = vpop.f32.mrf.mxu1 }
 0x102   :  { %494 = vst [vmem:[%s1254_s3 + $0x50] sm:$0xff] %v324_v25  ;;  %526 = vst [vmem:[%s1254_s3 + $0x150] sm:$0xff] %v420_v26  ;;  %v326_v29 = vadd.f32 %v325_v27, %v993_v46  ;;  %v422_v30 = vadd.f32 %v421_v28, %v993_v46 }
 0x103   :  { %v329_v31 = vpop.f32.mrf.mxu0  ;;  %v425_v32 = vpop.f32.mrf.mxu1 }
 0x104   :  { %495 = vst [vmem:[%s1254_s3 + $0x58] sm:$0xff] %v326_v29  ;;  %527 = vst [vmem:[%s1254_s3 + $0x158] sm:$0xff] %v422_v30  ;;  %v330_v33 = vadd.f32 %v329_v31, %v991_v45  ;;  %v426_v34 = vadd.f32 %v425_v32, %v991_v45 }
 0x105   :  { %v331_v35 = vpop.f32.mrf.mxu0  ;;  %v427_v36 = vpop.f32.mrf.mxu1 }
 0x106   :  { %496 = vst [vmem:[%s1254_s3 + $0x60] sm:$0xff] %v330_v33  ;;  %528 = vst [vmem:[%s1254_s3 + $0x160] sm:$0xff] %v426_v34  ;;  %v332_v37 = vadd.f32 %v331_v35, %v993_v46  ;;  %v428_v38 = vadd.f32 %v427_v36, %v993_v46 }
 0x107   :  { %v335_v39 = vpop.f32.mrf.mxu0  ;;  %v431_v40 = vpop.f32.mrf.mxu1 }
 0x108   :  { %497 = vst [vmem:[%s1254_s3 + $0x68] sm:$0xff] %v332_v37  ;;  %529 = vst [vmem:[%s1254_s3 + $0x168] sm:$0xff] %v428_v38  ;;  %v336_v41 = vadd.f32 %v335_v39, %v991_v45  ;;  %v432_v42 = vadd.f32 %v431_v40, %v991_v45 }
 0x109   :  { %v337_v43 = vpop.f32.mrf.mxu0  ;;  %v433_v44 = vpop.f32.mrf.mxu1 }
 0x10a   :  { %498 = vst [vmem:[%s1254_s3 + $0x70] sm:$0xff] %v336_v41  ;;  %530 = vst [vmem:[%s1254_s3 + $0x170] sm:$0xff] %v432_v42  ;;  %v338_v47 = vadd.f32 %v337_v43, %v993_v46  ;;  %v434_v48 = vadd.f32 %v433_v44, %v993_v46 }
 0x10b   :  { %v341_v49 = vpop.f32.mrf.mxu0  ;;  %v437_v50 = vpop.f32.mrf.mxu1 }
 0x10c   :  { %499 = vst [vmem:[%s1254_s3 + $0x78] sm:$0xff] %v338_v47  ;;  %531 = vst [vmem:[%s1254_s3 + $0x178] sm:$0xff] %v434_v48  ;;  %v342_v51 = vadd.f32 %v341_v49, %v991_v45  ;;  %v438_v52 = vadd.f32 %v437_v50, %v991_v45 }
 0x10d   :  { %v343_v53 = vpop.f32.mrf.mxu0  ;;  %v439_v54 = vpop.f32.mrf.mxu1 }
 0x10e   :  { %500 = vst [vmem:[%s1254_s3 + $0x80] sm:$0xff] %v342_v51  ;;  %532 = vst [vmem:[%s1254_s3 + $0x180] sm:$0xff] %v438_v52  ;;  %v344_v55 = vadd.f32 %v343_v53, %v993_v46  ;;  %v440_v56 = vadd.f32 %v439_v54, %v993_v46 }
 0x10f   :  { %v347_v57 = vpop.f32.mrf.mxu0  ;;  %v443_v58 = vpop.f32.mrf.mxu1 }
 0x110   :  { %501 = vst [vmem:[%s1254_s3 + $0x88] sm:$0xff] %v344_v55  ;;  %533 = vst [vmem:[%s1254_s3 + $0x188] sm:$0xff] %v440_v56  ;;  %v348_v59 = vadd.f32 %v347_v57, %v991_v45  ;;  %v444_v60 = vadd.f32 %v443_v58, %v991_v45 }
 0x111   :  { %v349_v61 = vpop.f32.mrf.mxu0  ;;  %v445_v62 = vpop.f32.mrf.mxu1 }
 0x112   :  { %502 = vst [vmem:[%s1254_s3 + $0x90] sm:$0xff] %v348_v59  ;;  %534 = vst [vmem:[%s1254_s3 + $0x190] sm:$0xff] %v444_v60  ;;  %v350_v63 = vadd.f32 %v349_v61, %v993_v46  ;;  %v446_v0 = vadd.f32 %v445_v62, %v993_v46 }
 0x113   :  { %v353_v1 = vpop.f32.mrf.mxu0  ;;  %v449_v2 = vpop.f32.mrf.mxu1 }
 0x114   :  { %503 = vst [vmem:[%s1254_s3 + $0x98] sm:$0xff] %v350_v63  ;;  %535 = vst [vmem:[%s1254_s3 + $0x198] sm:$0xff] %v446_v0  ;;  %v354_v3 = vadd.f32 %v353_v1, %v991_v45  ;;  %v450_v4 = vadd.f32 %v449_v2, %v991_v45 }
 0x115   :  { %v355_v5 = vpop.f32.mrf.mxu0  ;;  %v451_v6 = vpop.f32.mrf.mxu1 }
 0x116   :  { %504 = vst [vmem:[%s1254_s3 + $0xa0] sm:$0xff] %v354_v3  ;;  %536 = vst [vmem:[%s1254_s3 + $0x1a0] sm:$0xff] %v450_v4  ;;  %v356_v7 = vadd.f32 %v355_v5, %v993_v46  ;;  %v452_v8 = vadd.f32 %v451_v6, %v993_v46 }
 0x117   :  { %v359_v9 = vpop.f32.mrf.mxu0  ;;  %v455_v10 = vpop.f32.mrf.mxu1 }
 0x118   :  { %505 = vst [vmem:[%s1254_s3 + $0xa8] sm:$0xff] %v356_v7  ;;  %537 = vst [vmem:[%s1254_s3 + $0x1a8] sm:$0xff] %v452_v8  ;;  %v360_v11 = vadd.f32 %v359_v9, %v991_v45  ;;  %v456_v12 = vadd.f32 %v455_v10, %v991_v45 }
 0x119   :  { %v361_v13 = vpop.f32.mrf.mxu0  ;;  %v457_v14 = vpop.f32.mrf.mxu1 }
 0x11a   :  { %506 = vst [vmem:[%s1254_s3 + $0xb0] sm:$0xff] %v360_v11  ;;  %538 = vst [vmem:[%s1254_s3 + $0x1b0] sm:$0xff] %v456_v12  ;;  %v362_v15 = vadd.f32 %v361_v13, %v993_v46  ;;  %v458_v16 = vadd.f32 %v457_v14, %v993_v46 }
 0x11b   :  { %v365_v17 = vpop.f32.mrf.mxu0  ;;  %v461_v18 = vpop.f32.mrf.mxu1 }
 0x11c   :  { %507 = vst [vmem:[%s1254_s3 + $0xb8] sm:$0xff] %v362_v15  ;;  %539 = vst [vmem:[%s1254_s3 + $0x1b8] sm:$0xff] %v458_v16  ;;  %v366_v19 = vadd.f32 %v365_v17, %v991_v45  ;;  %v462_v20 = vadd.f32 %v461_v18, %v991_v45 }
 0x11d   :  { %v367_v21 = vpop.f32.mrf.mxu0  ;;  %v463_v22 = vpop.f32.mrf.mxu1 }
 0x11e   :  { %508 = vst [vmem:[%s1254_s3 + $0xc0] sm:$0xff] %v366_v19  ;;  %540 = vst [vmem:[%s1254_s3 + $0x1c0] sm:$0xff] %v462_v20  ;;  %v368_v23 = vadd.f32 %v367_v21, %v993_v46  ;;  %v464_v24 = vadd.f32 %v463_v22, %v993_v46 }
 0x11f   :  { %v371_v25 = vpop.f32.mrf.mxu0  ;;  %v467_v26 = vpop.f32.mrf.mxu1 }
 0x120   :  { %509 = vst [vmem:[%s1254_s3 + $0xc8] sm:$0xff] %v368_v23  ;;  %541 = vst [vmem:[%s1254_s3 + $0x1c8] sm:$0xff] %v464_v24  ;;  %v372_v27 = vadd.f32 %v371_v25, %v991_v45  ;;  %v468_v28 = vadd.f32 %v467_v26, %v991_v45 }
 0x121   :  { %v373_v29 = vpop.f32.mrf.mxu0  ;;  %v469_v30 = vpop.f32.mrf.mxu1 }
 0x122   :  { %510 = vst [vmem:[%s1254_s3 + $0xd0] sm:$0xff] %v372_v27  ;;  %542 = vst [vmem:[%s1254_s3 + $0x1d0] sm:$0xff] %v468_v28  ;;  %v374_v31 = vadd.f32 %v373_v29, %v993_v46  ;;  %v470_v32 = vadd.f32 %v469_v30, %v993_v46 }
 0x123   :  { %v377_v33 = vpop.f32.mrf.mxu0  ;;  %v473_v34 = vpop.f32.mrf.mxu1 }
 0x124   :  { %511 = vst [vmem:[%s1254_s3 + $0xd8] sm:$0xff] %v374_v31  ;;  %543 = vst [vmem:[%s1254_s3 + $0x1d8] sm:$0xff] %v470_v32  ;;  %v378_v35 = vadd.f32 %v377_v33, %v991_v45  ;;  %v474_v36 = vadd.f32 %v473_v34, %v991_v45 }
 0x125   :  { %v379_v37 = vpop.f32.mrf.mxu0  ;;  %v475_v38 = vpop.f32.mrf.mxu1 }
 0x126   :  { %512 = vst [vmem:[%s1254_s3 + $0xe0] sm:$0xff] %v378_v35  ;;  %544 = vst [vmem:[%s1254_s3 + $0x1e0] sm:$0xff] %v474_v36  ;;  %v380_v39 = vadd.f32 %v379_v37, %v993_v46  ;;  %v476_v40 = vadd.f32 %v475_v38, %v993_v46 }
 0x127   :  { %v383_v41 = vpop.f32.mrf.mxu0  ;;  %v479_v42 = vpop.f32.mrf.mxu1 }
 0x128   :  { %513 = vst [vmem:[%s1254_s3 + $0xe8] sm:$0xff] %v380_v39  ;;  %545 = vst [vmem:[%s1254_s3 + $0x1e8] sm:$0xff] %v476_v40  ;;  %v384_v43 = vadd.f32 %v383_v41, %v991_v45  ;;  %v480_v44 = vadd.f32 %v479_v42, %v991_v45 }
 0x129   :  { %v385_v47 = vpop.f32.mrf.mxu0  ;;  %v481_v48 = vpop.f32.mrf.mxu1 }
 0x12a   :  { %514 = vst [vmem:[%s1254_s3 + $0xf0] sm:$0xff] %v384_v43  ;;  %546 = vst [vmem:[%s1254_s3 + $0x1f0] sm:$0xff] %v480_v44  ;;  %v386_v49 = vadd.f32 %v385_v47, %v993_v46  ;;  %v482_v50 = vadd.f32 %v481_v48, %v993_v46 }
 0x12c   :  { %515 = vst [vmem:[%s1254_s3 + $0xf8] sm:$0xff] %v386_v49  ;;  %547 = vst [vmem:[%s1254_s3 + $0x1f8] sm:$0xff] %v482_v50 }

</bundles_post_ra>
